<compile_context>
chip_gen: v7x
topology: tpu7x:2x2x1
jax: 0.10.0
libtpu: 0.0.40
codegen_flags: <defaults>
</compile_context>

<pallas_src>
import functools

import numpy as np
import jax
import jax.numpy as jnp
from jax.experimental import pallas as pl
from jax.experimental.pallas import tpu as pltpu

_SQRT1_2 = 0.7071067811865476
_EPS = 1e-6


# ----------------------------- in-kernel math helpers ------------------------

def _erf_approx(x):
    # Abramowitz & Stegun 7.1.26, |err| < 1.5e-7 -> matches torch's exact GELU.
    a1, a2, a3, a4, a5 = 0.254829592, -0.284496736, 1.421413741, -1.453152027, 1.061405429
    p = 0.3275911
    neg = x < 0.0
    ax = jnp.where(neg, -x, x)
    t = 1.0 / (1.0 + p * ax)
    poly = ((((a5 * t + a4) * t + a3) * t + a2) * t + a1) * t
    y = 1.0 - poly * jnp.exp(-ax * ax)
    return jnp.where(neg, -y, y)


def _gelu(x):
    return 0.5 * x * (1.0 + _erf_approx(x * _SQRT1_2))


def _sigmoid(x):
    return 1.0 / (1.0 + jnp.exp(-x))


# --------------------------------- fused kernel -------------------------------

def _sfmb_kernel(x_ref, ln_ref, mdt_ref, w1_ref, b1_ref, k2_ref, b2_ref,
                 k3_ref, b3_ref, mup_ref, mask_ref, wt_ref, fb1_ref, w2_ref,
                 fb2_ref, o_ref, *, W, eps):
    P = x_ref.shape[2]
    hid = wt_ref.shape[1]

    x = x_ref[0]                                   # (C, P)
    ln = ln_ref[...]                               # (C, 4): [n1_w, n1_b, n2_w, n2_b]

    # ---- norm1 (channels_first LayerNorm over C; biased variance) ----
    u = jnp.mean(x, axis=0, keepdims=True)
    d = x - u
    s = jnp.mean(d * d, axis=0, keepdims=True)
    xn1 = ln[:, 0:1] * (d / jnp.sqrt(s + eps)) + ln[:, 1:2]

    # ---- SFRL: down-resize -> conv1x1+GELU (x3, permutes folded into kron
    #      matrices) -> up-resize -> gate multiply.  All 2D MXU matmuls. ----
    y0 = jnp.dot(xn1, mdt_ref[...], preferred_element_type=jnp.float32)     # (C, C*C)
    g1 = _gelu(jnp.dot(w1_ref[...], y0, preferred_element_type=jnp.float32)
               + b1_ref[...])                                               # (o1, a*C+b)
    g2 = _gelu(jnp.dot(g1, k2_ref[...], preferred_element_type=jnp.float32)
               + b2_ref[...])                                               # (o1, o2*C+b)
    g3 = _sigmoid(jnp.dot(g2, k3_ref[...], preferred_element_type=jnp.float32)
                  + b3_ref[...])                                            # (o1, o2*C+o3)
    yup = jnp.dot(g3, mup_ref[...], preferred_element_type=jnp.float32)     # (C, P)
    sfrl = xn1 * yup

    # ---- norm2 ----
    u2 = jnp.mean(sfrl, axis=0, keepdims=True)
    d2 = sfrl - u2
    s2 = jnp.mean(d2 * d2, axis=0, keepdims=True)
    xn2 = ln[:, 2:3] * (d2 / jnp.sqrt(s2 + eps)) + ln[:, 3:4]

    # ---- FC: 3x3 conv via 9 shifted matmuls + GELU + 1x1 conv + residual ----
    masks = mask_ref[...]                           # (9, P) border-validity masks
    xn2_2 = jnp.concatenate([xn2, xn2], axis=1)     # (C, 2P), lane-aligned concat
    acc = jnp.zeros((hid, P), jnp.float32)
    ti = 0
    for dy in (-1, 0, 1):
        for dx in (-1, 0, 1):
            k = (dy * W + dx) % P
            # xs[:, p] = xn2[:, (p + dy*W + dx) mod P], out-of-image taps zeroed
            xs = xn2_2[:, k:k + P] * masks[ti:ti + 1, :]
            acc = acc + jnp.dot(wt_ref[ti], xs,
                                preferred_element_type=jnp.float32)
            ti += 1
    h = _gelu(acc + fb1_ref[...])                                          # (hid, P)
    y = jnp.dot(w2_ref[...], h, preferred_element_type=jnp.float32) + fb2_ref[...]
    o_ref[0] = y + sfrl


# ------------------------------ wrapper ---------------------------------------

def sfmb_forward(x, kp):
    N, C, H, W = x.shape
    P = H * W
    CC = C * C
    hid = kp["w1t"].shape[1]
    x2 = x.reshape(N, C, P)

    out = pl.pallas_call(
        functools.partial(_sfmb_kernel, W=W, eps=_EPS),
        out_shape=jax.ShapeDtypeStruct((N, C, P), x.dtype),
        grid=(N,),
        in_specs=[
            pl.BlockSpec((1, C, P), lambda n: (n, 0, 0)),     # x
            pl.BlockSpec((C, 4), lambda n: (0, 0)),           # layernorm params
            pl.BlockSpec((P, CC), lambda n: (0, 0)),          # down-resize kron^T
            pl.BlockSpec((C, C), lambda n: (0, 0)),           # s_w1
            pl.BlockSpec((C, 1), lambda n: (0, 0)),           # s_b1
            pl.BlockSpec((CC, CC), lambda n: (0, 0)),         # kron(W2^T, I)
            pl.BlockSpec((1, CC), lambda n: (0, 0)),          # b2 (repeated)
            pl.BlockSpec((CC, CC), lambda n: (0, 0)),         # kron(I, W3^T)
            pl.BlockSpec((1, CC), lambda n: (0, 0)),          # b3 (tiled)
            pl.BlockSpec((CC, P), lambda n: (0, 0)),          # up-resize kron^T
            pl.BlockSpec((9, P), lambda n: (0, 0)),           # 3x3 tap masks
            pl.BlockSpec((9, hid, C), lambda n: (0, 0, 0)),   # 3x3 weights per tap
            pl.BlockSpec((hid, 1), lambda n: (0, 0)),         # f_b1
            pl.BlockSpec((C, hid), lambda n: (0, 0)),         # f_w2
            pl.BlockSpec((C, 1), lambda n: (0, 0)),           # f_b2
        ],
        out_specs=pl.BlockSpec((1, C, P), lambda n: (n, 0, 0)),
        compiler_params=pltpu.CompilerParams(
            dimension_semantics=("parallel",)),
    )(x2, kp["ln"], kp["mdt"], kp["w1"], kp["b1"], kp["k2"], kp["b2"],
      kp["k3"], kp["b3"], kp["mup"], kp["masks"], kp["w1t"], kp["fb1"],
      kp["w2"], kp["fb2"])
    return out.reshape(N, C, H, W)


# ----------------------- host-side parameter preparation ----------------------

def interp_matrix(out_size, in_size):
    # 1D linear-interp matrix, align_corners=True semantics
    M = np.zeros((out_size, in_size), dtype=np.float32)
    if out_size == 1:
        M[0, 0] = 1.0
        return M
    for i in range(out_size):
        src = i * (in_size - 1) / (out_size - 1)
        lo = int(np.floor(src))
        hi = min(lo + 1, in_size - 1)
        frac = src - lo
        M[i, lo] += 1.0 - frac
        M[i, hi] += frac
    return M


def _conv3x3_masks(H, W):
    P = H * W
    hh = np.repeat(np.arange(H), W)
    ww = np.tile(np.arange(W), H)
    rows = []
    for dy in (-1, 0, 1):
        for dx in (-1, 0, 1):
            ok = (hh + dy >= 0) & (hh + dy < H) & (ww + dx >= 0) & (ww + dx < W)
            rows.append(ok.astype(np.float32))
    return np.stack(rows, axis=0)                   # (9, P)


def prepare_params(params, H, W):
    """Fold resizes/permutes into kron matrices; flatten conv weights for the kernel."""
    C = params["s_w1"].shape[0]
    hid = params["f_w1"].shape[0]
    Ad = params["Adown"]            # (C, H)
    Bd = params["BdownT"].T         # (C, W)
    Au = params["Aup"]              # (H, C)
    Bu = params["BupT"].T           # (W, C)
    eye = jnp.eye(C, dtype=jnp.float32)
    return {
        "ln": jnp.stack([params["n1_w"], params["n1_b"],
                         params["n2_w"], params["n2_b"]], axis=1),          # (C, 4)
        "mdt": jnp.kron(Ad, Bd).T,                                          # (P, C*C)
        "mup": jnp.kron(Au, Bu).T,                                          # (C*C, P)
        "w1": params["s_w1"],                                               # (C, C)
        "b1": params["s_b1"].reshape(C, 1),
        "k2": jnp.kron(params["s_w2"].T, eye),                              # (C*C, C*C)
        "b2": jnp.repeat(params["s_b2"], C).reshape(1, C * C),
        "k3": jnp.kron(eye, params["s_w3"].T),                              # (C*C, C*C)
        "b3": jnp.tile(params["s_b3"], C).reshape(1, C * C),
        "masks": jnp.asarray(_conv3x3_masks(H, W)),                         # (9, P)
        "w1t": jnp.transpose(params["f_w1"], (2, 3, 0, 1)).reshape(9, hid, C),
        "fb1": params["f_b1"].reshape(hid, 1),
        "w2": params["f_w2"].reshape(C, hid),
        "fb2": params["f_b2"].reshape(C, 1),
    }


def init_params(key, dim, ffn_scale, H, W):
    hidden = int(dim * ffn_scale)
    keys = jax.random.split(key, 10)

    def rnd(k, shape, scale):
        return (scale * jax.random.normal(k, shape)).astype(jnp.float32)

    p = {
        "n1_w": jnp.ones((dim,), jnp.float32), "n1_b": jnp.zeros((dim,), jnp.float32),
        "n2_w": jnp.ones((dim,), jnp.float32), "n2_b": jnp.zeros((dim,), jnp.float32),
        # SFRL 1x1 convs (weight[o, c] = Conv2d weight[o, c, 0, 0])
        "s_w1": rnd(keys[0], (dim, dim), 0.2), "s_b1": rnd(keys[1], (dim,), 0.1),
        "s_w2": rnd(keys[2], (dim, dim), 0.2), "s_b2": rnd(keys[3], (dim,), 0.1),
        "s_w3": rnd(keys[4], (dim, dim), 0.2), "s_b3": rnd(keys[5], (dim,), 0.1),
        # FC: Conv2d(dim, hidden, 3, 1, 1) and Conv2d(hidden, dim, 1)
        "f_w1": rnd(keys[6], (hidden, dim, 3, 3), 0.1), "f_b1": rnd(keys[7], (hidden,), 0.1),
        "f_w2": rnd(keys[8], (dim, hidden, 1, 1), 0.1), "f_b2": rnd(keys[9], (dim,), 0.1),
    }
    p["Adown"] = jnp.asarray(interp_matrix(dim, H))        # (C, H)
    p["BdownT"] = jnp.asarray(interp_matrix(dim, W).T)     # (W, C)
    p["Aup"] = jnp.asarray(interp_matrix(H, dim))          # (H, C)
    p["BupT"] = jnp.asarray(interp_matrix(W, dim).T)       # (C, W)
    return p


# --------------------------- pure-JAX reference check --------------------------

def sfmb_reference(x, params):
    def ln(v, w, b):
        u = jnp.mean(v, axis=1, keepdims=True)
        s = jnp.mean((v - u) ** 2, axis=1, keepdims=True)
        vh = (v - u) / jnp.sqrt(s + _EPS)
        return w[None, :, None, None] * vh + b[None, :, None, None]

    def gelu(v):
        return 0.5 * v * (1.0 + jax.scipy.special.erf(v * _SQRT1_2))

    def conv1x1(v, w, b):
        return jnp.einsum("oc,ncab->noab", w, v) + b[None, :, None, None]

    def resize(v, A, Bm):
        return jnp.einsum("ih,jw,nchw->ncij", A, Bm, v)

    xn1 = ln(x, params["n1_w"], params["n1_b"])
    y = resize(xn1, params["Adown"], params["BdownT"].T)
    y = gelu(conv1x1(y, params["s_w1"], params["s_b1"])).transpose(0, 2, 3, 1)
    y = gelu(conv1x1(y, params["s_w2"], params["s_b2"])).transpose(0, 2, 3, 1)
    y = (1.0 / (1.0 + jnp.exp(-conv1x1(y, params["s_w3"], params["s_b3"])))).transpose(0, 2, 3, 1)
    y = resize(y, params["Aup"], params["BupT"].T)
    sfrl = xn1 * y

    xn2 = ln(sfrl, params["n2_w"], params["n2_b"])
    h = jax.lax.conv_general_dilated(xn2, params["f_w1"], (1, 1), ((1, 1), (1, 1)),
                                     dimension_numbers=("NCHW", "OIHW", "NCHW"))
    h = gelu(h + params["f_b1"][None, :, None, None])
    out = jnp.einsum("oc,ncab->noab", params["f_w2"][:, :, 0, 0], h) \
        + params["f_b2"][None, :, None, None]
    return out + sfrl


# ------------------------------------ main -------------------------------------

if __name__ == "__main__":
    key = jax.random.PRNGKey(0)
    kx, kparam = jax.random.split(key)

    N, C, H, W = 2, 8, 16, 16       # dim=8, ffn_scale=2.0 -> hidden=16
    x = jax.random.normal(kx, (N, C, H, W), jnp.float32)
    params = init_params(kparam, C, 2.0, H, W)
    kp = prepare_params(params, H, W)

    out = jax.jit(sfmb_forward)(x, kp)
    out = jax.block_until_ready(out)

    ref = sfmb_reference(x, params)
    err = float(jnp.max(jnp.abs(out - ref)))
    assert out.shape == x.shape
    assert err < 2e-3, f"max abs err {err}"

    print("KERNEL_OK")
</pallas_src>

<mosaic_0001>
module attributes {stable_mosaic.version = 11 : i64} {
  func.func @_sfmb_kernel(%arg0: i32, %arg1: memref<1x8x256xf32, #tpu.memory_space<vmem>>, %arg2: memref<8x4xf32, #tpu.memory_space<vmem>>, %arg3: memref<256x64xf32, #tpu.memory_space<vmem>>, %arg4: memref<8x8xf32, #tpu.memory_space<vmem>>, %arg5: memref<8x1xf32, #tpu.memory_space<vmem>>, %arg6: memref<64x64xf32, #tpu.memory_space<vmem>>, %arg7: memref<1x64xf32, #tpu.memory_space<vmem>>, %arg8: memref<64x64xf32, #tpu.memory_space<vmem>>, %arg9: memref<1x64xf32, #tpu.memory_space<vmem>>, %arg10: memref<64x256xf32, #tpu.memory_space<vmem>>, %arg11: memref<9x256xf32, #tpu.memory_space<vmem>>, %arg12: memref<9x16x8xf32, #tpu.memory_space<vmem>>, %arg13: memref<16x1xf32, #tpu.memory_space<vmem>>, %arg14: memref<8x16xf32, #tpu.memory_space<vmem>>, %arg15: memref<8x1xf32, #tpu.memory_space<vmem>>, %arg16: memref<1x8x256xf32, #tpu.memory_space<vmem>>) attributes {dimension_semantics = [#tpu.dimension_semantics<parallel>], iteration_bounds = array<i64: 2>, scalar_prefetch = 0 : i64, scratch_operands = 0 : i64, tpu.core_type = #tpu.core_type<tc>, window_params = [{transform_indices = @transform_0, window_bounds = array<i64: 1, 8, 256>}, {pipeline_mode = #tpu.pipeline_mode<synchronous>, transform_indices = @transform_1, window_bounds = array<i64: 8, 4>}, {pipeline_mode = #tpu.pipeline_mode<synchronous>, transform_indices = @transform_2, window_bounds = array<i64: 256, 64>}, {pipeline_mode = #tpu.pipeline_mode<synchronous>, transform_indices = @transform_3, window_bounds = array<i64: 8, 8>}, {pipeline_mode = #tpu.pipeline_mode<synchronous>, transform_indices = @transform_4, window_bounds = array<i64: 8, 1>}, {pipeline_mode = #tpu.pipeline_mode<synchronous>, transform_indices = @transform_5, window_bounds = array<i64: 64, 64>}, {pipeline_mode = #tpu.pipeline_mode<synchronous>, transform_indices = @transform_6, window_bounds = array<i64: 1, 64>}, {pipeline_mode = #tpu.pipeline_mode<synchronous>, transform_indices = @transform_7, window_bounds = array<i64: 64, 64>}, {pipeline_mode = #tpu.pipeline_mode<synchronous>, transform_indices = @transform_8, window_bounds = array<i64: 1, 64>}, {pipeline_mode = #tpu.pipeline_mode<synchronous>, transform_indices = @transform_9, window_bounds = array<i64: 64, 256>}, {pipeline_mode = #tpu.pipeline_mode<synchronous>, transform_indices = @transform_10, window_bounds = array<i64: 9, 256>}, {pipeline_mode = #tpu.pipeline_mode<synchronous>, transform_indices = @transform_11, window_bounds = array<i64: 9, 16, 8>}, {pipeline_mode = #tpu.pipeline_mode<synchronous>, transform_indices = @transform_12, window_bounds = array<i64: 16, 1>}, {pipeline_mode = #tpu.pipeline_mode<synchronous>, transform_indices = @transform_13, window_bounds = array<i64: 8, 16>}, {pipeline_mode = #tpu.pipeline_mode<synchronous>, transform_indices = @transform_14, window_bounds = array<i64: 8, 1>}, {transform_indices = @transform_15, window_bounds = array<i64: 1, 8, 256>}]} {
    %c0 = arith.constant 0 : index
    %c0_0 = arith.constant 0 : index
    %c0_1 = arith.constant 0 : index
    %0 = vector.load %arg1[%c0, %c0_0, %c0_1] : memref<1x8x256xf32, #tpu.memory_space<vmem>>, vector<1x8x256xf32>
    %1 = vector.shape_cast %0 : vector<1x8x256xf32> to vector<8x256xf32>
    %c0_2 = arith.constant 0 : index
    %c0_3 = arith.constant 0 : index
    %2 = vector.load %arg2[%c0_2, %c0_3] : memref<8x4xf32, #tpu.memory_space<vmem>>, vector<8x4xf32>
    %cst = arith.constant dense<0.000000e+00> : vector<256xf32>
    %3 = vector.multi_reduction <add>, %1, %cst [0] : vector<8x256xf32> to vector<256xf32>
    %4 = vector.shape_cast %3 : vector<256xf32> to vector<1x256xf32>
    %cst_4 = arith.constant 8.000000e+00 : f32
    %5 = vector.broadcast %cst_4 : f32 to vector<1x256xf32>
    %6 = arith.divf %4, %5 : vector<1x256xf32>
    %7 = vector.broadcast %6 : vector<1x256xf32> to vector<8x256xf32>
    %8 = arith.subf %1, %7 : vector<8x256xf32>
    %9 = arith.mulf %8, %8 : vector<8x256xf32>
    %cst_5 = arith.constant dense<0.000000e+00> : vector<256xf32>
    %10 = vector.multi_reduction <add>, %9, %cst_5 [0] : vector<8x256xf32> to vector<256xf32>
    %11 = vector.shape_cast %10 : vector<256xf32> to vector<1x256xf32>
    %cst_6 = arith.constant 8.000000e+00 : f32
    %12 = vector.broadcast %cst_6 : f32 to vector<1x256xf32>
    %13 = arith.divf %11, %12 : vector<1x256xf32>
    %14 = vector.extract_strided_slice %2 {offsets = [0, 0], sizes = [8, 1], strides = [1, 1]} : vector<8x4xf32> to vector<8x1xf32>
    %cst_7 = arith.constant 9.99999997E-7 : f32
    %15 = vector.broadcast %cst_7 : f32 to vector<1x256xf32>
    %16 = arith.addf %13, %15 : vector<1x256xf32>
    %17 = math.sqrt %16 : vector<1x256xf32>
    %18 = vector.broadcast %17 : vector<1x256xf32> to vector<8x256xf32>
    %19 = arith.divf %8, %18 : vector<8x256xf32>
    %20 = vector.broadcast %14 : vector<8x1xf32> to vector<8x256xf32>
    %21 = arith.mulf %20, %19 : vector<8x256xf32>
    %22 = vector.extract_strided_slice %2 {offsets = [0, 1], sizes = [8, 1], strides = [1, 1]} : vector<8x4xf32> to vector<8x1xf32>
    %23 = vector.broadcast %22 : vector<8x1xf32> to vector<8x256xf32>
    %24 = arith.addf %21, %23 : vector<8x256xf32>
    %c0_8 = arith.constant 0 : index
    %c0_9 = arith.constant 0 : index
    %25 = vector.load %arg3[%c0_8, %c0_9] : memref<256x64xf32, #tpu.memory_space<vmem>>, vector<256x64xf32>
    %cst_10 = arith.constant dense<0.000000e+00> : vector<8x64xf32>
    %26 = tpu.matmul %24, %25, %cst_10 {dimension_numbers = #tpu.dot_dimension_numbers<[1], [0], [0], [1], [0, 0, 1, 1], [], []>} : vector<8x256xf32>, vector<256x64xf32>, vector<8x64xf32> -> vector<8x64xf32>
    %c0_11 = arith.constant 0 : index
    %c0_12 = arith.constant 0 : index
    %27 = vector.load %arg4[%c0_11, %c0_12] : memref<8x8xf32, #tpu.memory_space<vmem>>, vector<8x8xf32>
    %cst_13 = arith.constant dense<0.000000e+00> : vector<8x64xf32>
    %28 = tpu.matmul %27, %26, %cst_13 {dimension_numbers = #tpu.dot_dimension_numbers<[1], [0], [0], [1], [0, 0, 1, 1], [], []>} : vector<8x8xf32>, vector<8x64xf32>, vector<8x64xf32> -> vector<8x64xf32>
    %c0_14 = arith.constant 0 : index
    %c0_15 = arith.constant 0 : index
    %29 = vector.load %arg5[%c0_14, %c0_15] : memref<8x1xf32, #tpu.memory_space<vmem>>, vector<8x1xf32>
    %30 = vector.broadcast %29 : vector<8x1xf32> to vector<8x64xf32>
    %31 = arith.addf %28, %30 : vector<8x64xf32>
    %cst_16 = arith.constant 5.000000e-01 : f32
    %32 = vector.broadcast %cst_16 : f32 to vector<8x64xf32>
    %33 = arith.mulf %32, %31 : vector<8x64xf32>
    %cst_17 = arith.constant 0.707106769 : f32
    %34 = vector.broadcast %cst_17 : f32 to vector<8x64xf32>
    %35 = arith.mulf %31, %34 : vector<8x64xf32>
    %cst_18 = arith.constant 0.000000e+00 : f32
    %36 = vector.broadcast %cst_18 : f32 to vector<8x64xf32>
    %37 = arith.cmpf olt, %35, %36 : vector<8x64xf32>
    %cst_19 = arith.constant 0.000000e+00 : f32
    %38 = vector.broadcast %cst_19 : f32 to vector<8x64xf32>
    %39 = arith.subf %38, %35 : vector<8x64xf32>
    %40 = arith.select %37, %39, %35 : vector<8x64xi1>, vector<8x64xf32>
    %cst_20 = arith.constant 0.327591091 : f32
    %41 = vector.broadcast %cst_20 : f32 to vector<8x64xf32>
    %42 = arith.mulf %41, %40 : vector<8x64xf32>
    %cst_21 = arith.constant 1.000000e+00 : f32
    %43 = vector.broadcast %cst_21 : f32 to vector<8x64xf32>
    %44 = arith.addf %43, %42 : vector<8x64xf32>
    %cst_22 = arith.constant 1.000000e+00 : f32
    %45 = vector.broadcast %cst_22 : f32 to vector<8x64xf32>
    %46 = arith.divf %45, %44 : vector<8x64xf32>
    %cst_23 = arith.constant 1.06140542 : f32
    %47 = vector.broadcast %cst_23 : f32 to vector<8x64xf32>
    %48 = arith.mulf %47, %46 : vector<8x64xf32>
    %cst_24 = arith.constant -1.45315206 : f32
    %49 = vector.broadcast %cst_24 : f32 to vector<8x64xf32>
    %50 = arith.addf %48, %49 : vector<8x64xf32>
    %51 = arith.mulf %50, %46 : vector<8x64xf32>
    %cst_25 = arith.constant 1.42141378 : f32
    %52 = vector.broadcast %cst_25 : f32 to vector<8x64xf32>
    %53 = arith.addf %51, %52 : vector<8x64xf32>
    %54 = arith.mulf %53, %46 : vector<8x64xf32>
    %cst_26 = arith.constant -0.284496725 : f32
    %55 = vector.broadcast %cst_26 : f32 to vector<8x64xf32>
    %56 = arith.addf %54, %55 : vector<8x64xf32>
    %57 = arith.mulf %56, %46 : vector<8x64xf32>
    %cst_27 = arith.constant 0.254829586 : f32
    %58 = vector.broadcast %cst_27 : f32 to vector<8x64xf32>
    %59 = arith.addf %57, %58 : vector<8x64xf32>
    %60 = arith.mulf %59, %46 : vector<8x64xf32>
    %cst_28 = arith.constant 0.000000e+00 : f32
    %61 = vector.broadcast %cst_28 : f32 to vector<8x64xf32>
    %62 = arith.subf %61, %40 : vector<8x64xf32>
    %63 = arith.mulf %62, %40 : vector<8x64xf32>
    %64 = math.exp %63 : vector<8x64xf32>
    %65 = arith.mulf %60, %64 : vector<8x64xf32>
    %cst_29 = arith.constant 1.000000e+00 : f32
    %66 = vector.broadcast %cst_29 : f32 to vector<8x64xf32>
    %67 = arith.subf %66, %65 : vector<8x64xf32>
    %cst_30 = arith.constant 0.000000e+00 : f32
    %68 = vector.broadcast %cst_30 : f32 to vector<8x64xf32>
    %69 = arith.subf %68, %67 : vector<8x64xf32>
    %70 = arith.select %37, %69, %67 : vector<8x64xi1>, vector<8x64xf32>
    %cst_31 = arith.constant 1.000000e+00 : f32
    %71 = vector.broadcast %cst_31 : f32 to vector<8x64xf32>
    %72 = arith.addf %71, %70 : vector<8x64xf32>
    %73 = arith.mulf %33, %72 : vector<8x64xf32>
    %c0_32 = arith.constant 0 : index
    %c0_33 = arith.constant 0 : index
    %74 = vector.load %arg6[%c0_32, %c0_33] : memref<64x64xf32, #tpu.memory_space<vmem>>, vector<64x64xf32>
    %cst_34 = arith.constant dense<0.000000e+00> : vector<8x64xf32>
    %75 = tpu.matmul %73, %74, %cst_34 {dimension_numbers = #tpu.dot_dimension_numbers<[1], [0], [0], [1], [0, 0, 1, 1], [], []>} : vector<8x64xf32>, vector<64x64xf32>, vector<8x64xf32> -> vector<8x64xf32>
    %c0_35 = arith.constant 0 : index
    %c0_36 = arith.constant 0 : index
    %76 = vector.load %arg7[%c0_35, %c0_36] : memref<1x64xf32, #tpu.memory_space<vmem>>, vector<1x64xf32>
    %77 = vector.broadcast %76 : vector<1x64xf32> to vector<8x64xf32>
    %78 = arith.addf %75, %77 : vector<8x64xf32>
    %cst_37 = arith.constant 5.000000e-01 : f32
    %79 = vector.broadcast %cst_37 : f32 to vector<8x64xf32>
    %80 = arith.mulf %79, %78 : vector<8x64xf32>
    %cst_38 = arith.constant 0.707106769 : f32
    %81 = vector.broadcast %cst_38 : f32 to vector<8x64xf32>
    %82 = arith.mulf %78, %81 : vector<8x64xf32>
    %cst_39 = arith.constant 0.000000e+00 : f32
    %83 = vector.broadcast %cst_39 : f32 to vector<8x64xf32>
    %84 = arith.cmpf olt, %82, %83 : vector<8x64xf32>
    %cst_40 = arith.constant 0.000000e+00 : f32
    %85 = vector.broadcast %cst_40 : f32 to vector<8x64xf32>
    %86 = arith.subf %85, %82 : vector<8x64xf32>
    %87 = arith.select %84, %86, %82 : vector<8x64xi1>, vector<8x64xf32>
    %cst_41 = arith.constant 0.327591091 : f32
    %88 = vector.broadcast %cst_41 : f32 to vector<8x64xf32>
    %89 = arith.mulf %88, %87 : vector<8x64xf32>
    %cst_42 = arith.constant 1.000000e+00 : f32
    %90 = vector.broadcast %cst_42 : f32 to vector<8x64xf32>
    %91 = arith.addf %90, %89 : vector<8x64xf32>
    %cst_43 = arith.constant 1.000000e+00 : f32
    %92 = vector.broadcast %cst_43 : f32 to vector<8x64xf32>
    %93 = arith.divf %92, %91 : vector<8x64xf32>
    %cst_44 = arith.constant 1.06140542 : f32
    %94 = vector.broadcast %cst_44 : f32 to vector<8x64xf32>
    %95 = arith.mulf %94, %93 : vector<8x64xf32>
    %cst_45 = arith.constant -1.45315206 : f32
    %96 = vector.broadcast %cst_45 : f32 to vector<8x64xf32>
    %97 = arith.addf %95, %96 : vector<8x64xf32>
    %98 = arith.mulf %97, %93 : vector<8x64xf32>
    %cst_46 = arith.constant 1.42141378 : f32
    %99 = vector.broadcast %cst_46 : f32 to vector<8x64xf32>
    %100 = arith.addf %98, %99 : vector<8x64xf32>
    %101 = arith.mulf %100, %93 : vector<8x64xf32>
    %cst_47 = arith.constant -0.284496725 : f32
    %102 = vector.broadcast %cst_47 : f32 to vector<8x64xf32>
    %103 = arith.addf %101, %102 : vector<8x64xf32>
    %104 = arith.mulf %103, %93 : vector<8x64xf32>
    %cst_48 = arith.constant 0.254829586 : f32
    %105 = vector.broadcast %cst_48 : f32 to vector<8x64xf32>
    %106 = arith.addf %104, %105 : vector<8x64xf32>
    %107 = arith.mulf %106, %93 : vector<8x64xf32>
    %cst_49 = arith.constant 0.000000e+00 : f32
    %108 = vector.broadcast %cst_49 : f32 to vector<8x64xf32>
    %109 = arith.subf %108, %87 : vector<8x64xf32>
    %110 = arith.mulf %109, %87 : vector<8x64xf32>
    %111 = math.exp %110 : vector<8x64xf32>
    %112 = arith.mulf %107, %111 : vector<8x64xf32>
    %cst_50 = arith.constant 1.000000e+00 : f32
    %113 = vector.broadcast %cst_50 : f32 to vector<8x64xf32>
    %114 = arith.subf %113, %112 : vector<8x64xf32>
    %cst_51 = arith.constant 0.000000e+00 : f32
    %115 = vector.broadcast %cst_51 : f32 to vector<8x64xf32>
    %116 = arith.subf %115, %114 : vector<8x64xf32>
    %117 = arith.select %84, %116, %114 : vector<8x64xi1>, vector<8x64xf32>
    %cst_52 = arith.constant 1.000000e+00 : f32
    %118 = vector.broadcast %cst_52 : f32 to vector<8x64xf32>
    %119 = arith.addf %118, %117 : vector<8x64xf32>
    %120 = arith.mulf %80, %119 : vector<8x64xf32>
    %c0_53 = arith.constant 0 : index
    %c0_54 = arith.constant 0 : index
    %121 = vector.load %arg8[%c0_53, %c0_54] : memref<64x64xf32, #tpu.memory_space<vmem>>, vector<64x64xf32>
    %cst_55 = arith.constant dense<0.000000e+00> : vector<8x64xf32>
    %122 = tpu.matmul %120, %121, %cst_55 {dimension_numbers = #tpu.dot_dimension_numbers<[1], [0], [0], [1], [0, 0, 1, 1], [], []>} : vector<8x64xf32>, vector<64x64xf32>, vector<8x64xf32> -> vector<8x64xf32>
    %c0_56 = arith.constant 0 : index
    %c0_57 = arith.constant 0 : index
    %123 = vector.load %arg9[%c0_56, %c0_57] : memref<1x64xf32, #tpu.memory_space<vmem>>, vector<1x64xf32>
    %124 = vector.broadcast %123 : vector<1x64xf32> to vector<8x64xf32>
    %125 = arith.addf %122, %124 : vector<8x64xf32>
    %cst_58 = arith.constant 0.000000e+00 : f32
    %126 = vector.broadcast %cst_58 : f32 to vector<8x64xf32>
    %127 = arith.subf %126, %125 : vector<8x64xf32>
    %128 = math.exp %127 : vector<8x64xf32>
    %cst_59 = arith.constant 1.000000e+00 : f32
    %129 = vector.broadcast %cst_59 : f32 to vector<8x64xf32>
    %130 = arith.addf %129, %128 : vector<8x64xf32>
    %cst_60 = arith.constant 1.000000e+00 : f32
    %131 = vector.broadcast %cst_60 : f32 to vector<8x64xf32>
    %132 = arith.divf %131, %130 : vector<8x64xf32>
    %c0_61 = arith.constant 0 : index
    %c0_62 = arith.constant 0 : index
    %133 = vector.load %arg10[%c0_61, %c0_62] : memref<64x256xf32, #tpu.memory_space<vmem>>, vector<64x256xf32>
    %cst_63 = arith.constant dense<0.000000e+00> : vector<8x256xf32>
    %134 = tpu.matmul %132, %133, %cst_63 {dimension_numbers = #tpu.dot_dimension_numbers<[1], [0], [0], [1], [0, 0, 1, 1], [], []>} : vector<8x64xf32>, vector<64x256xf32>, vector<8x256xf32> -> vector<8x256xf32>
    %135 = arith.mulf %24, %134 : vector<8x256xf32>
    %cst_64 = arith.constant dense<0.000000e+00> : vector<256xf32>
    %136 = vector.multi_reduction <add>, %135, %cst_64 [0] : vector<8x256xf32> to vector<256xf32>
    %137 = vector.shape_cast %136 : vector<256xf32> to vector<1x256xf32>
    %cst_65 = arith.constant 8.000000e+00 : f32
    %138 = vector.broadcast %cst_65 : f32 to vector<1x256xf32>
    %139 = arith.divf %137, %138 : vector<1x256xf32>
    %140 = vector.broadcast %139 : vector<1x256xf32> to vector<8x256xf32>
    %141 = arith.subf %135, %140 : vector<8x256xf32>
    %142 = arith.mulf %141, %141 : vector<8x256xf32>
    %cst_66 = arith.constant dense<0.000000e+00> : vector<256xf32>
    %143 = vector.multi_reduction <add>, %142, %cst_66 [0] : vector<8x256xf32> to vector<256xf32>
    %144 = vector.shape_cast %143 : vector<256xf32> to vector<1x256xf32>
    %cst_67 = arith.constant 8.000000e+00 : f32
    %145 = vector.broadcast %cst_67 : f32 to vector<1x256xf32>
    %146 = arith.divf %144, %145 : vector<1x256xf32>
    %147 = vector.extract_strided_slice %2 {offsets = [0, 2], sizes = [8, 1], strides = [1, 1]} : vector<8x4xf32> to vector<8x1xf32>
    %cst_68 = arith.constant 9.99999997E-7 : f32
    %148 = vector.broadcast %cst_68 : f32 to vector<1x256xf32>
    %149 = arith.addf %146, %148 : vector<1x256xf32>
    %150 = math.sqrt %149 : vector<1x256xf32>
    %151 = vector.broadcast %150 : vector<1x256xf32> to vector<8x256xf32>
    %152 = arith.divf %141, %151 : vector<8x256xf32>
    %153 = vector.broadcast %147 : vector<8x1xf32> to vector<8x256xf32>
    %154 = arith.mulf %153, %152 : vector<8x256xf32>
    %155 = vector.extract_strided_slice %2 {offsets = [0, 3], sizes = [8, 1], strides = [1, 1]} : vector<8x4xf32> to vector<8x1xf32>
    %156 = vector.broadcast %155 : vector<8x1xf32> to vector<8x256xf32>
    %157 = arith.addf %154, %156 : vector<8x256xf32>
    %c0_69 = arith.constant 0 : index
    %c0_70 = arith.constant 0 : index
    %158 = vector.load %arg11[%c0_69, %c0_70] : memref<9x256xf32, #tpu.memory_space<vmem>>, vector<9x256xf32>
    %159 = tpu.concatenate %157, %157 in 1 : vector<8x256xf32>, vector<8x256xf32> -> vector<8x512xf32>
    %cst_71 = arith.constant 0.000000e+00 : f32
    %160 = vector.broadcast %cst_71 : f32 to vector<16x256xf32>
    %161 = vector.extract_strided_slice %159 {offsets = [0, 239], sizes = [8, 256], strides = [1, 1]} : vector<8x512xf32> to vector<8x256xf32>
    %162 = vector.extract_strided_slice %158 {offsets = [0, 0], sizes = [1, 256], strides = [1, 1]} : vector<9x256xf32> to vector<1x256xf32>
    %163 = vector.broadcast %162 : vector<1x256xf32> to vector<8x256xf32>
    %164 = arith.mulf %161, %163 : vector<8x256xf32>
    %c0_72 = arith.constant 0 : index
    %c0_73 = arith.constant 0 : index
    %c0_74 = arith.constant 0 : index
    %165 = vector.load %arg12[%c0_72, %c0_73, %c0_74] : memref<9x16x8xf32, #tpu.memory_space<vmem>>, vector<1x16x8xf32>
    %166 = vector.shape_cast %165 : vector<1x16x8xf32> to vector<16x8xf32>
    %cst_75 = arith.constant dense<0.000000e+00> : vector<16x256xf32>
    %167 = tpu.matmul %166, %164, %cst_75 {dimension_numbers = #tpu.dot_dimension_numbers<[1], [0], [0], [1], [0, 0, 1, 1], [], []>} : vector<16x8xf32>, vector<8x256xf32>, vector<16x256xf32> -> vector<16x256xf32>
    %168 = arith.addf %160, %167 : vector<16x256xf32>
    %169 = vector.extract_strided_slice %159 {offsets = [0, 240], sizes = [8, 256], strides = [1, 1]} : vector<8x512xf32> to vector<8x256xf32>
    %170 = vector.extract_strided_slice %158 {offsets = [1, 0], sizes = [1, 256], strides = [1, 1]} : vector<9x256xf32> to vector<1x256xf32>
    %171 = vector.broadcast %170 : vector<1x256xf32> to vector<8x256xf32>
    %172 = arith.mulf %169, %171 : vector<8x256xf32>
    %c1 = arith.constant 1 : index
    %c0_76 = arith.constant 0 : index
    %c0_77 = arith.constant 0 : index
    %173 = vector.load %arg12[%c1, %c0_76, %c0_77] : memref<9x16x8xf32, #tpu.memory_space<vmem>>, vector<1x16x8xf32>
    %174 = vector.shape_cast %173 : vector<1x16x8xf32> to vector<16x8xf32>
    %cst_78 = arith.constant dense<0.000000e+00> : vector<16x256xf32>
    %175 = tpu.matmul %174, %172, %cst_78 {dimension_numbers = #tpu.dot_dimension_numbers<[1], [0], [0], [1], [0, 0, 1, 1], [], []>} : vector<16x8xf32>, vector<8x256xf32>, vector<16x256xf32> -> vector<16x256xf32>
    %176 = arith.addf %168, %175 : vector<16x256xf32>
    %177 = vector.extract_strided_slice %159 {offsets = [0, 241], sizes = [8, 256], strides = [1, 1]} : vector<8x512xf32> to vector<8x256xf32>
    %178 = vector.extract_strided_slice %158 {offsets = [2, 0], sizes = [1, 256], strides = [1, 1]} : vector<9x256xf32> to vector<1x256xf32>
    %179 = vector.broadcast %178 : vector<1x256xf32> to vector<8x256xf32>
    %180 = arith.mulf %177, %179 : vector<8x256xf32>
    %c2 = arith.constant 2 : index
    %c0_79 = arith.constant 0 : index
    %c0_80 = arith.constant 0 : index
    %181 = vector.load %arg12[%c2, %c0_79, %c0_80] : memref<9x16x8xf32, #tpu.memory_space<vmem>>, vector<1x16x8xf32>
    %182 = vector.shape_cast %181 : vector<1x16x8xf32> to vector<16x8xf32>
    %cst_81 = arith.constant dense<0.000000e+00> : vector<16x256xf32>
    %183 = tpu.matmul %182, %180, %cst_81 {dimension_numbers = #tpu.dot_dimension_numbers<[1], [0], [0], [1], [0, 0, 1, 1], [], []>} : vector<16x8xf32>, vector<8x256xf32>, vector<16x256xf32> -> vector<16x256xf32>
    %184 = arith.addf %176, %183 : vector<16x256xf32>
    %185 = vector.extract_strided_slice %159 {offsets = [0, 255], sizes = [8, 256], strides = [1, 1]} : vector<8x512xf32> to vector<8x256xf32>
    %186 = vector.extract_strided_slice %158 {offsets = [3, 0], sizes = [1, 256], strides = [1, 1]} : vector<9x256xf32> to vector<1x256xf32>
    %187 = vector.broadcast %186 : vector<1x256xf32> to vector<8x256xf32>
    %188 = arith.mulf %185, %187 : vector<8x256xf32>
    %c3 = arith.constant 3 : index
    %c0_82 = arith.constant 0 : index
    %c0_83 = arith.constant 0 : index
    %189 = vector.load %arg12[%c3, %c0_82, %c0_83] : memref<9x16x8xf32, #tpu.memory_space<vmem>>, vector<1x16x8xf32>
    %190 = vector.shape_cast %189 : vector<1x16x8xf32> to vector<16x8xf32>
    %cst_84 = arith.constant dense<0.000000e+00> : vector<16x256xf32>
    %191 = tpu.matmul %190, %188, %cst_84 {dimension_numbers = #tpu.dot_dimension_numbers<[1], [0], [0], [1], [0, 0, 1, 1], [], []>} : vector<16x8xf32>, vector<8x256xf32>, vector<16x256xf32> -> vector<16x256xf32>
    %192 = arith.addf %184, %191 : vector<16x256xf32>
    %193 = vector.extract_strided_slice %159 {offsets = [0, 0], sizes = [8, 256], strides = [1, 1]} : vector<8x512xf32> to vector<8x256xf32>
    %194 = vector.extract_strided_slice %158 {offsets = [4, 0], sizes = [1, 256], strides = [1, 1]} : vector<9x256xf32> to vector<1x256xf32>
    %195 = vector.broadcast %194 : vector<1x256xf32> to vector<8x256xf32>
    %196 = arith.mulf %193, %195 : vector<8x256xf32>
    %c4 = arith.constant 4 : index
    %c0_85 = arith.constant 0 : index
    %c0_86 = arith.constant 0 : index
    %197 = vector.load %arg12[%c4, %c0_85, %c0_86] : memref<9x16x8xf32, #tpu.memory_space<vmem>>, vector<1x16x8xf32>
    %198 = vector.shape_cast %197 : vector<1x16x8xf32> to vector<16x8xf32>
    %cst_87 = arith.constant dense<0.000000e+00> : vector<16x256xf32>
    %199 = tpu.matmul %198, %196, %cst_87 {dimension_numbers = #tpu.dot_dimension_numbers<[1], [0], [0], [1], [0, 0, 1, 1], [], []>} : vector<16x8xf32>, vector<8x256xf32>, vector<16x256xf32> -> vector<16x256xf32>
    %200 = arith.addf %192, %199 : vector<16x256xf32>
    %201 = vector.extract_strided_slice %159 {offsets = [0, 1], sizes = [8, 256], strides = [1, 1]} : vector<8x512xf32> to vector<8x256xf32>
    %202 = vector.extract_strided_slice %158 {offsets = [5, 0], sizes = [1, 256], strides = [1, 1]} : vector<9x256xf32> to vector<1x256xf32>
    %203 = vector.broadcast %202 : vector<1x256xf32> to vector<8x256xf32>
    %204 = arith.mulf %201, %203 : vector<8x256xf32>
    %c5 = arith.constant 5 : index
    %c0_88 = arith.constant 0 : index
    %c0_89 = arith.constant 0 : index
    %205 = vector.load %arg12[%c5, %c0_88, %c0_89] : memref<9x16x8xf32, #tpu.memory_space<vmem>>, vector<1x16x8xf32>
    %206 = vector.shape_cast %205 : vector<1x16x8xf32> to vector<16x8xf32>
    %cst_90 = arith.constant dense<0.000000e+00> : vector<16x256xf32>
    %207 = tpu.matmul %206, %204, %cst_90 {dimension_numbers = #tpu.dot_dimension_numbers<[1], [0], [0], [1], [0, 0, 1, 1], [], []>} : vector<16x8xf32>, vector<8x256xf32>, vector<16x256xf32> -> vector<16x256xf32>
    %208 = arith.addf %200, %207 : vector<16x256xf32>
    %209 = vector.extract_strided_slice %159 {offsets = [0, 15], sizes = [8, 256], strides = [1, 1]} : vector<8x512xf32> to vector<8x256xf32>
    %210 = vector.extract_strided_slice %158 {offsets = [6, 0], sizes = [1, 256], strides = [1, 1]} : vector<9x256xf32> to vector<1x256xf32>
    %211 = vector.broadcast %210 : vector<1x256xf32> to vector<8x256xf32>
    %212 = arith.mulf %209, %211 : vector<8x256xf32>
    %c6 = arith.constant 6 : index
    %c0_91 = arith.constant 0 : index
    %c0_92 = arith.constant 0 : index
    %213 = vector.load %arg12[%c6, %c0_91, %c0_92] : memref<9x16x8xf32, #tpu.memory_space<vmem>>, vector<1x16x8xf32>
    %214 = vector.shape_cast %213 : vector<1x16x8xf32> to vector<16x8xf32>
    %cst_93 = arith.constant dense<0.000000e+00> : vector<16x256xf32>
    %215 = tpu.matmul %214, %212, %cst_93 {dimension_numbers = #tpu.dot_dimension_numbers<[1], [0], [0], [1], [0, 0, 1, 1], [], []>} : vector<16x8xf32>, vector<8x256xf32>, vector<16x256xf32> -> vector<16x256xf32>
    %216 = arith.addf %208, %215 : vector<16x256xf32>
    %217 = vector.extract_strided_slice %159 {offsets = [0, 16], sizes = [8, 256], strides = [1, 1]} : vector<8x512xf32> to vector<8x256xf32>
    %218 = vector.extract_strided_slice %158 {offsets = [7, 0], sizes = [1, 256], strides = [1, 1]} : vector<9x256xf32> to vector<1x256xf32>
    %219 = vector.broadcast %218 : vector<1x256xf32> to vector<8x256xf32>
    %220 = arith.mulf %217, %219 : vector<8x256xf32>
    %c7 = arith.constant 7 : index
    %c0_94 = arith.constant 0 : index
    %c0_95 = arith.constant 0 : index
    %221 = vector.load %arg12[%c7, %c0_94, %c0_95] : memref<9x16x8xf32, #tpu.memory_space<vmem>>, vector<1x16x8xf32>
    %222 = vector.shape_cast %221 : vector<1x16x8xf32> to vector<16x8xf32>
    %cst_96 = arith.constant dense<0.000000e+00> : vector<16x256xf32>
    %223 = tpu.matmul %222, %220, %cst_96 {dimension_numbers = #tpu.dot_dimension_numbers<[1], [0], [0], [1], [0, 0, 1, 1], [], []>} : vector<16x8xf32>, vector<8x256xf32>, vector<16x256xf32> -> vector<16x256xf32>
    %224 = arith.addf %216, %223 : vector<16x256xf32>
    %225 = vector.extract_strided_slice %159 {offsets = [0, 17], sizes = [8, 256], strides = [1, 1]} : vector<8x512xf32> to vector<8x256xf32>
    %226 = vector.extract_strided_slice %158 {offsets = [8, 0], sizes = [1, 256], strides = [1, 1]} : vector<9x256xf32> to vector<1x256xf32>
    %227 = vector.broadcast %226 : vector<1x256xf32> to vector<8x256xf32>
    %228 = arith.mulf %225, %227 : vector<8x256xf32>
    %c8 = arith.constant 8 : index
    %c0_97 = arith.constant 0 : index
    %c0_98 = arith.constant 0 : index
    %229 = vector.load %arg12[%c8, %c0_97, %c0_98] : memref<9x16x8xf32, #tpu.memory_space<vmem>>, vector<1x16x8xf32>
    %230 = vector.shape_cast %229 : vector<1x16x8xf32> to vector<16x8xf32>
    %cst_99 = arith.constant dense<0.000000e+00> : vector<16x256xf32>
    %231 = tpu.matmul %230, %228, %cst_99 {dimension_numbers = #tpu.dot_dimension_numbers<[1], [0], [0], [1], [0, 0, 1, 1], [], []>} : vector<16x8xf32>, vector<8x256xf32>, vector<16x256xf32> -> vector<16x256xf32>
    %232 = arith.addf %224, %231 : vector<16x256xf32>
    %c0_100 = arith.constant 0 : index
    %c0_101 = arith.constant 0 : index
    %233 = vector.load %arg13[%c0_100, %c0_101] : memref<16x1xf32, #tpu.memory_space<vmem>>, vector<16x1xf32>
    %234 = vector.broadcast %233 : vector<16x1xf32> to vector<16x256xf32>
    %235 = arith.addf %232, %234 : vector<16x256xf32>
    %cst_102 = arith.constant 5.000000e-01 : f32
    %236 = vector.broadcast %cst_102 : f32 to vector<16x256xf32>
    %237 = arith.mulf %236, %235 : vector<16x256xf32>
    %cst_103 = arith.constant 0.707106769 : f32
    %238 = vector.broadcast %cst_103 : f32 to vector<16x256xf32>
    %239 = arith.mulf %235, %238 : vector<16x256xf32>
    %cst_104 = arith.constant 0.000000e+00 : f32
    %240 = vector.broadcast %cst_104 : f32 to vector<16x256xf32>
    %241 = arith.cmpf olt, %239, %240 : vector<16x256xf32>
    %cst_105 = arith.constant 0.000000e+00 : f32
    %242 = vector.broadcast %cst_105 : f32 to vector<16x256xf32>
    %243 = arith.subf %242, %239 : vector<16x256xf32>
    %244 = arith.select %241, %243, %239 : vector<16x256xi1>, vector<16x256xf32>
    %cst_106 = arith.constant 0.327591091 : f32
    %245 = vector.broadcast %cst_106 : f32 to vector<16x256xf32>
    %246 = arith.mulf %245, %244 : vector<16x256xf32>
    %cst_107 = arith.constant 1.000000e+00 : f32
    %247 = vector.broadcast %cst_107 : f32 to vector<16x256xf32>
    %248 = arith.addf %247, %246 : vector<16x256xf32>
    %cst_108 = arith.constant 1.000000e+00 : f32
    %249 = vector.broadcast %cst_108 : f32 to vector<16x256xf32>
    %250 = arith.divf %249, %248 : vector<16x256xf32>
    %cst_109 = arith.constant 1.06140542 : f32
    %251 = vector.broadcast %cst_109 : f32 to vector<16x256xf32>
    %252 = arith.mulf %251, %250 : vector<16x256xf32>
    %cst_110 = arith.constant -1.45315206 : f32
    %253 = vector.broadcast %cst_110 : f32 to vector<16x256xf32>
    %254 = arith.addf %252, %253 : vector<16x256xf32>
    %255 = arith.mulf %254, %250 : vector<16x256xf32>
    %cst_111 = arith.constant 1.42141378 : f32
    %256 = vector.broadcast %cst_111 : f32 to vector<16x256xf32>
    %257 = arith.addf %255, %256 : vector<16x256xf32>
    %258 = arith.mulf %257, %250 : vector<16x256xf32>
    %cst_112 = arith.constant -0.284496725 : f32
    %259 = vector.broadcast %cst_112 : f32 to vector<16x256xf32>
    %260 = arith.addf %258, %259 : vector<16x256xf32>
    %261 = arith.mulf %260, %250 : vector<16x256xf32>
    %cst_113 = arith.constant 0.254829586 : f32
    %262 = vector.broadcast %cst_113 : f32 to vector<16x256xf32>
    %263 = arith.addf %261, %262 : vector<16x256xf32>
    %264 = arith.mulf %263, %250 : vector<16x256xf32>
    %cst_114 = arith.constant 0.000000e+00 : f32
    %265 = vector.broadcast %cst_114 : f32 to vector<16x256xf32>
    %266 = arith.subf %265, %244 : vector<16x256xf32>
    %267 = arith.mulf %266, %244 : vector<16x256xf32>
    %268 = math.exp %267 : vector<16x256xf32>
    %269 = arith.mulf %264, %268 : vector<16x256xf32>
    %cst_115 = arith.constant 1.000000e+00 : f32
    %270 = vector.broadcast %cst_115 : f32 to vector<16x256xf32>
    %271 = arith.subf %270, %269 : vector<16x256xf32>
    %cst_116 = arith.constant 0.000000e+00 : f32
    %272 = vector.broadcast %cst_116 : f32 to vector<16x256xf32>
    %273 = arith.subf %272, %271 : vector<16x256xf32>
    %274 = arith.select %241, %273, %271 : vector<16x256xi1>, vector<16x256xf32>
    %cst_117 = arith.constant 1.000000e+00 : f32
    %275 = vector.broadcast %cst_117 : f32 to vector<16x256xf32>
    %276 = arith.addf %275, %274 : vector<16x256xf32>
    %277 = arith.mulf %237, %276 : vector<16x256xf32>
    %c0_118 = arith.constant 0 : index
    %c0_119 = arith.constant 0 : index
    %278 = vector.load %arg14[%c0_118, %c0_119] : memref<8x16xf32, #tpu.memory_space<vmem>>, vector<8x16xf32>
    %cst_120 = arith.constant dense<0.000000e+00> : vector<8x256xf32>
    %279 = tpu.matmul %278, %277, %cst_120 {dimension_numbers = #tpu.dot_dimension_numbers<[1], [0], [0], [1], [0, 0, 1, 1], [], []>} : vector<8x16xf32>, vector<16x256xf32>, vector<8x256xf32> -> vector<8x256xf32>
    %c0_121 = arith.constant 0 : index
    %c0_122 = arith.constant 0 : index
    %280 = vector.load %arg15[%c0_121, %c0_122] : memref<8x1xf32, #tpu.memory_space<vmem>>, vector<8x1xf32>
    %281 = vector.broadcast %280 : vector<8x1xf32> to vector<8x256xf32>
    %282 = arith.addf %279, %281 : vector<8x256xf32>
    %283 = arith.addf %282, %135 : vector<8x256xf32>
    %c0_123 = arith.constant 0 : index
    %c0_124 = arith.constant 0 : index
    %c0_125 = arith.constant 0 : index
    %284 = vector.load %arg16[%c0_123, %c0_124, %c0_125] : memref<1x8x256xf32, #tpu.memory_space<vmem>>, vector<1x8x256xf32>
    %285 = vector.shape_cast %284 : vector<1x8x256xf32> to vector<8x256xf32>
    %286 = vector.shape_cast %283 : vector<8x256xf32> to vector<1x8x256xf32>
    tpu.vector_store %arg16[%c0_123, %c0_124, %c0_125], %286 {strides = array<i32>} : memref<1x8x256xf32, #tpu.memory_space<vmem>>, vector<1x8x256xf32>,
    return
  }
  func.func @transform_0(%arg0: i32) -> (i32, i32, i32) {
    %c0_i32 = arith.constant 0 : i32
    %c0_i32_0 = arith.constant 0 : i32
    %c0_i32_1 = arith.constant 0 : i32
    return %arg0, %c0_i32, %c0_i32_0 : i32, i32, i32
  }
  func.func @transform_1(%arg0: i32) -> (i32, i32) {
    %c0_i32 = arith.constant 0 : i32
    %c0_i32_0 = arith.constant 0 : i32
    %c0_i32_1 = arith.constant 0 : i32
    return %c0_i32, %c0_i32_0 : i32, i32
  }
  func.func @transform_2(%arg0: i32) -> (i32, i32) {
    %c0_i32 = arith.constant 0 : i32
    %c0_i32_0 = arith.constant 0 : i32
    %c0_i32_1 = arith.constant 0 : i32
    return %c0_i32, %c0_i32_0 : i32, i32
  }
  func.func @transform_3(%arg0: i32) -> (i32, i32) {
    %c0_i32 = arith.constant 0 : i32
    %c0_i32_0 = arith.constant 0 : i32
    %c0_i32_1 = arith.constant 0 : i32
    return %c0_i32, %c0_i32_0 : i32, i32
  }
  func.func @transform_4(%arg0: i32) -> (i32, i32) {
    %c0_i32 = arith.constant 0 : i32
    %c0_i32_0 = arith.constant 0 : i32
    %c0_i32_1 = arith.constant 0 : i32
    return %c0_i32, %c0_i32_0 : i32, i32
  }
  func.func @transform_5(%arg0: i32) -> (i32, i32) {
    %c0_i32 = arith.constant 0 : i32
    %c0_i32_0 = arith.constant 0 : i32
    %c0_i32_1 = arith.constant 0 : i32
    return %c0_i32, %c0_i32_0 : i32, i32
  }
  func.func @transform_6(%arg0: i32) -> (i32, i32) {
    %c0_i32 = arith.constant 0 : i32
    %c0_i32_0 = arith.constant 0 : i32
    %c0_i32_1 = arith.constant 0 : i32
    return %c0_i32, %c0_i32_0 : i32, i32
  }
  func.func @transform_7(%arg0: i32) -> (i32, i32) {
    %c0_i32 = arith.constant 0 : i32
    %c0_i32_0 = arith.constant 0 : i32
    %c0_i32_1 = arith.constant 0 : i32
    return %c0_i32, %c0_i32_0 : i32, i32
  }
  func.func @transform_8(%arg0: i32) -> (i32, i32) {
    %c0_i32 = arith.constant 0 : i32
    %c0_i32_0 = arith.constant 0 : i32
    %c0_i32_1 = arith.constant 0 : i32
    return %c0_i32, %c0_i32_0 : i32, i32
  }
  func.func @transform_9(%arg0: i32) -> (i32, i32) {
    %c0_i32 = arith.constant 0 : i32
    %c0_i32_0 = arith.constant 0 : i32
    %c0_i32_1 = arith.constant 0 : i32
    return %c0_i32, %c0_i32_0 : i32, i32
  }
  func.func @transform_10(%arg0: i32) -> (i32, i32) {
    %c0_i32 = arith.constant 0 : i32
    %c0_i32_0 = arith.constant 0 : i32
    %c0_i32_1 = arith.constant 0 : i32
    return %c0_i32, %c0_i32_0 : i32, i32
  }
  func.func @transform_11(%arg0: i32) -> (i32, i32, i32) {
    %c0_i32 = arith.constant 0 : i32
    %c0_i32_0 = arith.constant 0 : i32
    %c0_i32_1 = arith.constant 0 : i32
    %c0_i32_2 = arith.constant 0 : i32
    return %c0_i32, %c0_i32_0, %c0_i32_1 : i32, i32, i32
  }
  func.func @transform_12(%arg0: i32) -> (i32, i32) {
    %c0_i32 = arith.constant 0 : i32
    %c0_i32_0 = arith.constant 0 : i32
    %c0_i32_1 = arith.constant 0 : i32
    return %c0_i32, %c0_i32_0 : i32, i32
  }
  func.func @transform_13(%arg0: i32) -> (i32, i32) {
    %c0_i32 = arith.constant 0 : i32
    %c0_i32_0 = arith.constant 0 : i32
    %c0_i32_1 = arith.constant 0 : i32
    return %c0_i32, %c0_i32_0 : i32, i32
  }
  func.func @transform_14(%arg0: i32) -> (i32, i32) {
    %c0_i32 = arith.constant 0 : i32
    %c0_i32_0 = arith.constant 0 : i32
    %c0_i32_1 = arith.constant 0 : i32
    return %c0_i32, %c0_i32_0 : i32, i32
  }
  func.func @transform_15(%arg0: i32) -> (i32, i32, i32) {
    %c0_i32 = arith.constant 0 : i32
    %c0_i32_0 = arith.constant 0 : i32
    %c0_i32_1 = arith.constant 0 : i32
    return %arg0, %c0_i32, %c0_i32_0 : i32, i32, i32
  }
}

</mosaic_0001>

<bundles_post_ra>
// kernel: sfmb_forward.1
= control target key start
LH: loop header
LB: loop body
LE: loop exit
PB: predicated region body
PF: predicated region fallthrough
CT: control target
= control target key end

     0   :  { %s2944_s18 = smov 0   ;;  %s3522_s0 = inlined_call_operand.vmem [shape: f32[2,8,256], index: 0, kind: input, shape index: {}]   ;;  %s3523_s1 = inlined_call_operand.vmem [shape: f32[8,4], index: 1, kind: input, shape index: {}]   ;;  %s3524_s2 = inlined_call_operand.vmem [shape: f32[256,64], index: 2, kind: input, shape index: {}]   ;;  %s3525_s3 = inlined_call_operand.vmem [shape: f32[8,8], index: 3, kind: input, shape index: {}]   ;;  %s3526_s4 = inlined_call_operand.vmem [shape: f32[8,1], index: 4, kind: input, shape index: {}]   ;;  %s3527_s5 = inlined_call_operand.vmem [shape: f32[64,64], index: 5, kind: input, shape index: {}]   ;;  %s3528_s6 = inlined_call_operand.vmem [shape: f32[1,64], index: 6, kind: input, shape index: {}]   ;;  %s3529_s7 = inlined_call_operand.vmem [shape: f32[64,64], index: 7, kind: input, shape index: {}]   ;;  %s3530_s8 = inlined_call_operand.vmem [shape: f32[1,64], index: 8, kind: input, shape index: {}]   ;;  %s3531_s9 = inlined_call_operand.vmem [shape: f32[64,256], index: 9, kind: input, shape index: {}]   ;;  %s3532_s10 = inlined_call_operand.vmem [shape: f32[9,256], index: 10, kind: input, shape index: {}]   ;;  %s3533_s11 = inlined_call_operand.vmem [shape: f32[9,16,8], index: 11, kind: input, shape index: {}]   ;;  %s3534_s12 = inlined_call_operand.vmem [shape: f32[16,1], index: 12, kind: input, shape index: {}]   ;;  %s3535_s13 = inlined_call_operand.vmem [shape: f32[8,16], index: 13, kind: input, shape index: {}]   ;;  %s3536_s14 = inlined_call_operand.vmem [shape: f32[8,1], index: 14, kind: input, shape index: {}]   ;;  %s3537_s15 = inlined_call_operand.vmem [shape: f32[2,8,256], index: 15, kind: output, shape index: {}]  }
   0x1 LB: > { %s2505_s19 = sadd.s32 4294967295, %s2847_s18   ;;  %p2509_p0 = scmp.ge.s32.totalorder %s2847_s18, 1  ;;  %s2847_s18 = sphi %s2944_s18, %s25_s18  }
   0x2   : > { %p437_p1 = scmp.lt.s32.totalorder %s2847_s18, 3 }
   0x4   : > { %p438_p2 = pnand %p2509_p0, %p437_p1 }
   0x5   : > { %v2955_v0 = vld [vmem:[%s3523_s1] sm:$0xff] (!%p438_p2)  ;;  %v581_v2 = vld [vmem:[%s3524_s2 + $0x88] sm:$0xff] (!%p438_p2)  ;;  %v2849_v3 = vmov (!%p438_p2), 0   ;;  %v582_v7 = vld [vmem:[%s3524_s2 + $0x90] sm:$0xff] (!%p438_p2)  ;;  %v2850_v19 = vmov (!%p438_p2), 1   ;;  %p485_p3 = scmp.lt.s32.totalorder (!%p438_p2), %s2505_s19, 1 }
   0x6   : > { %441 = sbr.rel (%p438_p2) target bundleno = 2080 (0x820), region = 80  ;;  %v580_v1 = vld [vmem:[%s3524_s2 + $0x80] sm:$0xff] (!%p438_p2)  ;;  %2790 = vset.pattern.permute.xlu0 (!%p438_p2), %v2849_v3  ;;  %v565_v6 = vld [vmem:[%s3524_s2 + $0x8] sm:$0xff] (!%p438_p2)  ;;  %2792 = vset.pattern.permute.xlu1 (!%p438_p2), %v2849_v3  ;;  %v583_v9 = vld [vmem:[%s3524_s2 + $0x98] sm:$0xff] (!%p438_p2)  ;;  %vm2852_vm4 = vmmov (!%p438_p2), 0   ;;  %vm673_vm5 = vcmask (!%p438_p2), 64512  }
   0x7   : > { %v2659_v4 = vpack.c.bf16 (!%p438_p2), %v581_v2, %v580_v1  ;;  %v564_v5 = vld [vmem:[%s3524_s2] sm:$0xff] (!%p438_p2)  ;;  %553 = vperm.xlu0 (!%p438_p2), %2790, %v2955_v0   ;;  %v566_v10 = vld [vmem:[%s3524_s2 + $0x10] sm:$0xff] (!%p438_p2)  ;;  %v567_v11 = vld [vmem:[%s3524_s2 + $0x18] sm:$0xff] (!%p438_p2)  ;;  %v2663_v12 = vpack.c.bf16 (!%p438_p2), %v583_v9, %v582_v7  ;;  %vm790_vm7 = vcmask (!%p438_p2), 523264   ;;  %s3539_s29 = smov (!%p438_p2), 111   ;;  %s2857_s30 = smov (!%p438_p2), 113  }
   0x8   : > { %v2661_v8 = vpack.c.bf16 (!%p438_p2), %v565_v6, %v564_v5  ;;  %v584_v13 = vld [vmem:[%s3524_s2 + $0xa0] sm:$0xff] (!%p438_p2)  ;;  %v585_v14 = vld [vmem:[%s3524_s2 + $0xa8] sm:$0xff] (!%p438_p2)  ;;  %v2665_v15 = vpack.c.bf16 (!%p438_p2), %v567_v11, %v566_v10  ;;  %v586_v20 = vld [vmem:[%s3524_s2 + $0xb0] sm:$0xff] (!%p438_p2)  ;;  %s2858_s16 = smov (!%p438_p2), 127   ;;  %s2859_s17 = smov (!%p438_p2), 1   ;;  %vm1160_vm13 = vcmask (!%p438_p2), 908288  }
   0x9   : > { %2660 = vmatprep.subr.bf16.mxu0 (!%p438_p2), %v2659_v4  ;;  %v2667_v16 = vpack.c.bf16 (!%p438_p2), %v585_v14, %v584_v13  ;;  %v568_v17 = vld [vmem:[%s3524_s2 + $0x20] sm:$0xff] (!%p438_p2)  ;;  %v569_v18 = vld [vmem:[%s3524_s2 + $0x28] sm:$0xff] (!%p438_p2)  ;;  %v587_v21 = vld [vmem:[%s3524_s2 + $0xb8] sm:$0xff] (!%p438_p2)  ;;  %s2860_s20 = smov (!%p438_p2), 15   ;;  %s2861_s22 = smov (!%p438_p2), 16   ;;  %vm1403_vm14 = vcmask (!%p438_p2), 924672  }
   0xa   : > { %2662 = vmatpush3.bf16.msra.mxu0 (!%p438_p2), %v2661_v8  ;;  %v2669_v22 = vpack.c.bf16 (!%p438_p2), %v569_v18, %v568_v17  ;;  %v2671_v23 = vpack.c.bf16 (!%p438_p2), %v587_v21, %v586_v20  ;;  %v570_v24 = vld [vmem:[%s3524_s2 + $0x30] sm:$0xff] (!%p438_p2)  ;;  %v571_v25 = vld [vmem:[%s3524_s2 + $0x38] sm:$0xff] (!%p438_p2)  ;;  %v588_v26 = vld [vmem:[%s3524_s2 + $0xc0] sm:$0xff] (!%p438_p2)  ;;  %s2862_s23 = smov (!%p438_p2), 112   ;;  %s2863_s28 = smov (!%p438_p2), 17   ;;  %vm1529_vm15 = vcmask (!%p438_p2), 1039360  }
   0xb   : > { %2664 = vmatprep.subr.bf16.mxu0 (!%p438_p2), %v2663_v12  ;;  %2791 = vset.pattern.permute.xlu0 (!%p438_p2), %v2850_v19  ;;  %v589_v27 = vld [vmem:[%s3524_s2 + $0xc8] sm:$0xff] (!%p438_p2)  ;;  %v2673_v28 = vpack.c.bf16 (!%p438_p2), %v571_v25, %v570_v24  ;;  %v572_v30 = vld [vmem:[%s3524_s2 + $0x40] sm:$0xff] (!%p438_p2)  ;;  %v590_v32 = vld [vmem:[%s3524_s2 + $0xd0] sm:$0xff] (!%p438_p2) }
   0xc   : > { %559 = vperm.xlu0 (!%p438_p2), %2791, %v2955_v0   ;;  %v2675_v29 = vpack.c.bf16 (!%p438_p2), %v589_v27, %v588_v26  ;;  %v573_v31 = vld [vmem:[%s3524_s2 + $0x48] sm:$0xff] (!%p438_p2)  ;;  %v591_v33 = vld [vmem:[%s3524_s2 + $0xd8] sm:$0xff] (!%p438_p2)  ;;  %v574_v36 = vld [vmem:[%s3524_s2 + $0x50] sm:$0xff] (!%p438_p2) }
   0xd   : > { %s3544_s19 = smov (!%p485_p3, %s2505_s19), 1  ;;  %v2677_v34 = vpack.c.bf16 %v573_v31, %v572_v30  ;;  %v2679_v35 = vpack.c.bf16 %v591_v33, %v590_v32  ;;  %v575_v37 = vld [vmem:[%s3524_s2 + $0x58] sm:$0xff]  ;;  %v592_v38 = vld [vmem:[%s3524_s2 + $0xe0] sm:$0xff]  ;;  %v593_v39 = vld [vmem:[%s3524_s2 + $0xe8] sm:$0xff] }
   0xe   : > { %2666 = vmatpush3.bf16.msra.mxu0 %v2665_v15  ;;  %s3538_s27 = sshll.u32 %s3544_s19, 4  ;;  %v2681_v40 = vpack.c.bf16 %v575_v37, %v574_v36  ;;  %v2683_v42 = vpack.c.bf16 %v593_v39, %v592_v38  ;;  %v576_v43 = vld [vmem:[%s3524_s2 + $0x60] sm:$0xff]  ;;  %v577_v44 = vld [vmem:[%s3524_s2 + $0x68] sm:$0xff]  ;;  %v594_v46 = vld [vmem:[%s3524_s2 + $0xf0] sm:$0xff] }
   0xf   : > { %2668 = vmatprep.subr.bf16.mxu0 %v2667_v16  ;;  %s489_s21 = scalar_lea.vmem %s3522_s0, %s3538_s27  ;;  %v595_v47 = vld [vmem:[%s3524_s2 + $0xf8] sm:$0xff]  ;;  %v2685_v49 = vpack.c.bf16 %v577_v44, %v576_v43  ;;  %v578_v52 = vld [vmem:[%s3524_s2 + $0x70] sm:$0xff]  ;;  %s3541_s27 = smov 111  }
  0x10   : > { %2795 = vset.pattern.permute.xlu0 %v2849_v3  ;;  %v495_v41 = vld [vmem:[%s489_s21] sm:$0xff]  ;;  %v496_v45 = vld [vmem:[%s489_s21 + $0x8] sm:$0xff]  ;;  %v2687_v51 = vpack.c.bf16 %v595_v47, %v594_v46  ;;  %v579_v53 = vld [vmem:[%s3524_s2 + $0x78] sm:$0xff] }
  0x11   : > { %v498_v48 = vrot.slane %v495_v41, 4  ;;  %v504_v50 = vrot.slane %v496_v45, 4  ;;  %v2689_v55 = vpack.c.bf16 %v579_v53, %v578_v52  ;;  %v667_v46 = vld [vmem:[%s3526_s4] sm:$0xff]  ;;  %v776_v52 = vld [vmem:[%s3527_s5 + $0x8] sm:$0xff] }
  0x12   : > { %2670 = vmatpush3.bf16.msra.mxu0 %v2669_v22  ;;  %670 = vperm.xlu1 %2792, %v667_v46  }
  0x13   : > { %2672 = vmatprep.subr.bf16.mxu0 %v2671_v23  ;;  %v499_v54 = vadd.f32 %v498_v48, %v495_v41  ;;  %v505_v56 = vadd.f32 %v504_v50, %v496_v45  ;;  %v666_v50 = vld [vmem:[%s3525_s3] sm:$0xff] }
  0x15   : > { %v500_v57 = vrot.slane %v499_v54, 2  ;;  %v506_v58 = vrot.slane %v505_v56, 2 }
  0x16   : > { %2674 = vmatpush3.bf16.msra.mxu0 %v2673_v28 }
  0x17   : > { %2676 = vmatprep.subr.bf16.mxu0 %v2675_v29  ;;  %v501_v59 = vadd.f32 %v500_v57, %v499_v54  ;;  %v507_v60 = vadd.f32 %v506_v58, %v505_v56  ;;  %v2853_v54 = vmov 0.0|0.0   ;;  %v778_v56 = vld [vmem:[%s3527_s5 + $0x18] sm:$0xff]  ;;  %v779_v58 = vld [vmem:[%s3527_s5 + $0x20] sm:$0xff] }
  0x18   : > { %2703 = vmatprep.subr.bf16.mxu1 %v2853_v54 }
  0x19   : > { %v502_v61 = vrot.slane %v501_v59, 1  ;;  %v508_v62 = vrot.slane %v507_v60, 1 }
  0x1a   : > { %2678 = vmatpush3.bf16.msra.mxu0 %v2677_v34 }
  0x1b   : > { %2680 = vmatprep.subr.bf16.mxu0 %v2679_v35  ;;  %v503_v63 = vadd.f32 %v502_v61, %v501_v59  ;;  %v509_v1 = vadd.f32 %v508_v62, %v507_v60  ;;  %v780_v59 = vld [vmem:[%s3527_s5 + $0x28] sm:$0xff]  ;;  %v781_v61 = vld [vmem:[%s3527_s5 + $0x30] sm:$0xff]  ;;  %v782_v62 = vld [vmem:[%s3527_s5 + $0x38] sm:$0xff] }
  0x1c   : > { %v2698_v60 = vpack.c.bf16 %v780_v59, %v779_v58 }
  0x1d   : > { %v511_v2 = vmul.f32 0.125, %v503_v63  ;;  %v512_v4 = vmul.f32 0.125, %v509_v1  ;;  %v2701_v63 = vpack.c.bf16 %v782_v62, %v781_v61 }
  0x1e   : > { %2682 = vmatpush3.bf16.msra.mxu0 %v2681_v40 }
  0x1f   : > { %2684 = vmatprep.subr.bf16.mxu0 %v2683_v42  ;;  %v513_v5 = vsub.f32 %v495_v41, %v511_v2  ;;  %v514_v6 = vsub.f32 %v496_v45, %v512_v4  ;;  %v2851_v45 = vmov 0.0  }
  0x20   : > { %2656 = vmatprep.mubr.msk.f32.mxu1 %vm2852_vm4, %v2851_v45 }
  0x21   : > { %v515_v7 = vmul.f32 %v513_v5, %v513_v5  ;;  %v516_v8 = vmul.f32 %v514_v6, %v514_v6 }
  0x22   : > { %2686 = vmatpush3.bf16.msra.mxu0 %v2685_v49 }
  0x23   : > { %2688 = vmatprep.subr.bf16.mxu0 %v2687_v51  ;;  %v517_v9 = vrot.slane %v515_v7, 4  ;;  %v523_v10 = vrot.slane %v516_v8, 4  ;;  %v775_v51 = vld [vmem:[%s3527_s5] sm:$0xff] }
  0x24   : > { %v2692_v53 = vpack.c.bf16 %v776_v52, %v775_v51 }
  0x25   : > { %v518_v11 = vadd.f32 %v517_v9, %v515_v7  ;;  %v524_v12 = vadd.f32 %v523_v10, %v516_v8 }
  0x26   : > { %2690 = vmatpush3.bf16.msra.mxu0 %v2689_v55  ;;  %v777_v55 = vld [vmem:[%s3527_s5 + $0x10] sm:$0xff] }
  0x27   : > { %v519_v13 = vrot.slane %v518_v11, 2  ;;  %v525_v14 = vrot.slane %v524_v12, 2  ;;  %2616 = vmatprep.subr.mxu0 %v2851_v45  ;;  %v2695_v57 = vpack.c.bf16 %v778_v56, %v777_v55 }
  0x29   : > { %v520_v15 = vadd.f32 %v519_v13, %v518_v11  ;;  %v526_v16 = vadd.f32 %v525_v14, %v524_v12 }
  0x2b   : > { %v521_v17 = vrot.slane %v520_v15, 1  ;;  %v527_v18 = vrot.slane %v526_v16, 1 }
  0x2d   : > { %v522_v19 = vadd.f32 %v521_v17, %v520_v15  ;;  %v528_v20 = vadd.f32 %v527_v18, %v526_v16 }
  0x2f   : > { %v529_v21 = vmul.f32 0.125, %v522_v19  ;;  %v530_v22 = vmul.f32 0.125, %v528_v20 }
  0x31   : > { %v531_v23 = vadd.f32 1e-06, %v529_v21  ;;  %v532_v24 = vadd.f32 1e-06, %v530_v22 }
  0x33   : > { %2797 = vrsqrt.f32 %v531_v23  ;;  %vm535_vm0 = vcmp.eq.f32.partialorder %v531_v23, inf  ;;  %vm542_vm1 = vcmp.eq.f32.partialorder %v532_v24, inf  ;;  %v538_v29 = vand.u32 2147483648, %v531_v23 }
  0x34   : > { %2799 = vrsqrt.f32 %v532_v24  ;;  %vm537_vm2 = vcmp.eq.f32.partialorder %v531_v23, 0.0  ;;  %v545_v31 = vand.u32 2147483648, %v532_v24  ;;  %vm544_vm3 = vcmp.eq.f32.partialorder %v532_v24, 0.0 }
  0x3d   : > { %v2798_v25 = vpop.eup %2797 }
  0x3e   : > { %v2800_v26 = vpop.eup %2799  ;;  %v534_v27 = vmul.f32 %v2798_v25, %v531_v23 }
  0x3f   : > { %v541_v28 = vmul.f32 %v2800_v26, %v532_v24 }
  0x40   : > { %v536_v30 = vsel %vm535_vm0, %v531_v23, %v534_v27  ;;  %vm1549_vm0 = vcmask 7168  }
  0x41   : > { %v543_v32 = vsel %vm542_vm1, %v532_v24, %v541_v28  ;;  %v539_v33 = vsel %vm537_vm2, %v538_v29, %v536_v30  ;;  %vm1423_vm1 = vcmask 121856   ;;  %vm1204_vm2 = vcmask 130048  }
  0x42   : > { %v546_v34 = vsel %vm544_vm3, %v545_v31, %v543_v32  ;;  %2801 = vrcp.f32 %v539_v33  ;;  %v892_v32 = vld [vmem:[%s3529_s7] sm:$0xff]  ;;  %v893_v33 = vld [vmem:[%s3529_s7 + $0x8] sm:$0xff]  ;;  %vm1184_vm3 = vcmask 916480  }
  0x43   : > { %2803 = vrcp.f32 %v546_v34  ;;  %v2704_v34 = vpack.c.bf16 %v893_v33, %v892_v32  ;;  %v999_v32 = vld [vmem:[%s3531_s9 + $0x68] sm:$0xff]  ;;  %v1001_v33 = vld [vmem:[%s3531_s9 + $0x78] sm:$0xff] }
  0x45   : > { %2705 = vmatpush3.bf16.msra.mxu1 %v2704_v34 }
  0x46   : > { %2706 = vmatprep.subr.bf16.mxu1 %v2853_v54 }
  0x4c   : > { %v2802_v35 = vpop.eup %2801 }
  0x4d   : > { %v2804_v36 = vpop.eup %2803  ;;  %v548_v38 = vmul.f32 %v2802_v35, %v513_v5  ;;  %v894_v35 = vld [vmem:[%s3529_s7 + $0x10] sm:$0xff] }
  0x4e   : > { %v550_v39 = vmul.f32 %v2804_v36, %v514_v6  ;;  %v895_v36 = vld [vmem:[%s3529_s7 + $0x18] sm:$0xff] }
  0x86   : > { %v554_v37 = vpop.permute.xlu0 %553 }
  0x87   : > { %v556_v40 = vmul.f32 %v554_v37, %v548_v38  ;;  %v557_v41 = vmul.f32 %v554_v37, %v550_v39  ;;  %v2707_v37 = vpack.c.bf16 %v895_v36, %v894_v35  ;;  %v896_v38 = vld [vmem:[%s3529_s7 + $0x20] sm:$0xff]  ;;  %v897_v39 = vld [vmem:[%s3529_s7 + $0x28] sm:$0xff]  ;;  %v2727_v35 = vpack.c.bf16 %v1001_v33, %v999_v32 }
  0x88   : > { %v998_v36 = vld [vmem:[%s3531_s9 + $0x60] sm:$0xff] }
  0x89   : > { %2708 = vmatpush3.bf16.msra.mxu1 %v2707_v37  ;;  %v1000_v37 = vld [vmem:[%s3531_s9 + $0x70] sm:$0xff] }
  0x8a   : > { %2709 = vmatprep.subr.bf16.mxu1 %v2853_v54 }
  0x8b   : > { %v560_v42 = vpop.permute.xlu0 %559 }
  0x8c   : > { %v3070_v43 = vadd.f32 %v560_v42, %v556_v40  ;;  %v3072_v44 = vadd.f32 %v560_v42, %v557_v41  ;;  %v2710_v40 = vpack.c.bf16 %v897_v39, %v896_v38  ;;  %v898_v41 = vld [vmem:[%s3529_s7 + $0x30] sm:$0xff]  ;;  %v899_v42 = vld [vmem:[%s3529_s7 + $0x38] sm:$0xff]  ;;  %v2729_v38 = vpack.c.bf16 %v1000_v37, %v998_v36 }
  0x8d   : > { %v2713_v46 = vpack.c.bf16 %v899_v42, %v898_v41  ;;  %v1146_v39 = vlaneseq  ;;  %v3208_v42 = vld [vmem:[%s3532_s10] sm:$0xff] }
  0x8e   : > { %660 = vmatprep.mubr.f32.mxu0 %v3072_v44  ;;  %2711 = vmatpush3.bf16.msra.mxu1 %v2710_v40  ;;  %v2854_v40 = vmov 2  }
  0x8f   : > { %661 = vmatmul.mubr.f32.vlgmr.msra.gmra.mrb[0].mxu0 %v3070_v43  ;;  %2712 = vmatprep.subr.bf16.mxu1 %v2853_v54  ;;  %v3203_v41 = vshrl.u32 %v1146_v39, 7 }
  0x90   : > { %2618 = vmatprep.mubr.msk.f32.mxu0 %vm2852_vm4, %v2851_v45  ;;  %2793 = vset.pattern.permute.xlu1 %v2854_v40 }
  0x91   : > { %v671_v1 = vpop.permute.xlu1 %670  ;;  %1131 = vperm.xlu1 %2793, %v2955_v0  }
  0x92   : > { %2714 = vmatpush3.bf16.msra.mxu1 %v2713_v46  ;;  %v3213_v46 = vld [vmem:[%s3532_s10 + $0x8] sm:$0xff] }
 0x162   : > { %v2593_v47 = vpop.f32.mrb[0].mxu0 }
 0x163   : > { %v2594_v48 = vpop.f32.mrb[1].mxu0 }
 0x164   : > { %v2595_v49 = vadd.f32 %v2594_v48, %v2593_v47  ;;  %v2515_v47 = vld [vmem:[%s3528_s6] ss:$0 sm:$0xff] }
 0x166   : > { %2617 = vmatpush3.msra.mxu0 %v2595_v49 }
 0x167   : > { %2619 = vmatmul.mubr.msk.f32.vlgmr.msra.gmra.mrb[2].mxu0 %vm673_vm5, %v666_v50  ;;  %2691 = vmatprep.subr.bf16.mxu0 %v2853_v54 }
 0x168   : > { %2637 = vmatprep.mubr.msk.f32.mxu0 %vm2852_vm4, %v2851_v45  ;;  %2693 = vmatpush3.bf16.msra.mxu0 %v2692_v53  ;;  %vm1301_vm4 = vcmask 138240  }
 0x169   : > { %2694 = vmatprep.subr.bf16.mxu0 %v2853_v54 }
 0x16c   : > { %2696 = vmatpush3.bf16.msra.mxu0 %v2695_v57 }
 0x16d   : > { %2697 = vmatprep.subr.bf16.mxu0 %v2853_v54 }
 0x170   : > { %2699 = vmatpush3.bf16.msra.mxu0 %v2698_v60 }
 0x171   : > { %2700 = vmatprep.subr.bf16.mxu0 %v2853_v54 }
 0x174   : > { %2702 = vmatpush3.bf16.msra.mxu0 %v2701_v63 }
 0x23a   : > { %v743_v2 = vpop.f32.mrb[2].mxu0 }
 0x23b   : > { %v744_v4 = vadd.f32 %v743_v2, %v671_v1  ;;  %v2620_v5 = vpop.f32.mrb[3].mxu0 }
 0x23d   : > { %v748_v6 = vmul.f32 0.70710677, %v744_v4  ;;  %v747_v29 = vmul.f32 0.5, %v744_v4 }
 0x23f   : > { %vm749_vm6 = vcmp.lt.f32.partialorder %v748_v6, 0.0  ;;  %v750_v7 = vsub.f32 0.0, %v748_v6 }
 0x241   : > { %v751_v8 = vsel %vm749_vm6, %v750_v7, %v748_v6 }
 0x242   : > { %v752_v9 = vmul.f32 0.3275911, %v751_v8  ;;  %v765_v11 = vsub.f32 0.0, %v751_v8 }
 0x244   : > { %v753_v10 = vadd.f32 1.0, %v752_v9  ;;  %v766_v13 = vmul.f32 %v765_v11, %v751_v8 }
 0x246   : > { %2805 = vrcp.f32 %v753_v10  ;;  %v767_v16 = vmul.f32 1.442695, %v766_v13 }
 0x248   : > { %2807 = vpow2.f32 %v767_v16  ;;  %v989_v16 = vld [vmem:[%s3531_s9 + $0x18] sm:$0xff] }
 0x250   : > { %v2806_v12 = vpop.eup %2805 }
 0x251   : > { %v756_v14 = vmul.f32 1.0614054, %v2806_v12 }
 0x252   : > { %v2808_v24 = vpop.eup %2807 }
 0x253   : > { %v757_v15 = vadd.f32 -1.4531521, %v756_v14 }
 0x255   : > { %v758_v17 = vmul.f32 %v2806_v12, %v757_v15  ;;  %v987_v15 = vld [vmem:[%s3531_s9 + $0x8] sm:$0xff] }
 0x257   : > { %v759_v18 = vadd.f32 1.4214138, %v758_v17  ;;  %v2715_v17 = vpack.c.bf16 %v989_v16, %v987_v15 }
 0x259   : > { %v760_v19 = vmul.f32 %v2806_v12, %v759_v18  ;;  %v986_v18 = vld [vmem:[%s3531_s9] sm:$0xff]  ;;  %2716 = vmatprep.subr.bf16.mxu0 %v2715_v17 }
 0x25b   : > { %v761_v20 = vadd.f32 -0.28449672, %v760_v19  ;;  %v988_v19 = vld [vmem:[%s3531_s9 + $0x10] sm:$0xff] }
 0x25d   : > { %v762_v21 = vmul.f32 %v2806_v12, %v761_v20  ;;  %v2717_v20 = vpack.c.bf16 %v988_v19, %v986_v18 }
 0x25f   : > { %v763_v22 = vadd.f32 0.2548296, %v762_v21  ;;  %v991_v21 = vld [vmem:[%s3531_s9 + $0x28] sm:$0xff] }
 0x261   : > { %v764_v23 = vmul.f32 %v2806_v12, %v763_v22  ;;  %v993_v22 = vld [vmem:[%s3531_s9 + $0x38] sm:$0xff] }
 0x263   : > { %v769_v25 = vmul.f32 %v2808_v24, %v764_v23  ;;  %v2719_v23 = vpack.c.bf16 %v993_v22, %v991_v21  ;;  %v990_v24 = vld [vmem:[%s3531_s9 + $0x20] sm:$0xff] }
 0x265   : > { %v770_v26 = vsub.f32 1.0, %v769_v25  ;;  %v992_v25 = vld [vmem:[%s3531_s9 + $0x30] sm:$0xff] }
 0x267   : > { %v771_v27 = vsub.f32 0.0, %v770_v26 }
 0x269   : > { %v772_v28 = vsel %vm749_vm6, %v771_v27, %v770_v26  ;;  %v2721_v26 = vpack.c.bf16 %v992_v25, %v990_v24  ;;  %v995_v27 = vld [vmem:[%s3531_s9 + $0x48] sm:$0xff] }
 0x26a   : > { %v773_v30 = vadd.f32 1.0, %v772_v28  ;;  %v997_v28 = vld [vmem:[%s3531_s9 + $0x58] sm:$0xff] }
 0x26c   : > { %v774_v31 = vmul.f32 %v773_v30, %v747_v29  ;;  %v994_v29 = vld [vmem:[%s3531_s9 + $0x40] sm:$0xff]  ;;  %v2723_v30 = vpack.c.bf16 %v997_v28, %v995_v27 }
 0x26e   : > { %2638 = vmatmul.mubr.msk.f32.vlgmr.msra.gmra.mrb[4].mxu0 %vm790_vm7, %v774_v31  ;;  %v996_v31 = vld [vmem:[%s3531_s9 + $0x50] sm:$0xff] }
 0x26f   : > { %1069 = vmatprep.mubr.f32.mxu0 %v2851_v45  ;;  %2718 = vmatpush1.bf16.msra.mxu0 %v2717_v20  ;;  %v2725_v34 = vpack.c.bf16 %v996_v31, %v994_v29 }
 0x270   : > { %2720 = vmatprep.subr.bf16.mxu0 %v2719_v23 }
 0x273   : > { %2722 = vmatpush1.bf16.msra.mxu0 %v2721_v26 }
 0x274   : > { %2724 = vmatprep.subr.bf16.mxu0 %v2723_v30 }
 0x277   : > { %2726 = vmatpush1.bf16.msra.mxu0 %v2725_v34 }
 0x278   : > { %2728 = vmatprep.subr.bf16.mxu0 %v2727_v35 }
 0x27b   : > { %2730 = vmatpush1.bf16.msra.mxu0 %v2729_v38 }
 0x341   : > { %v860_v48 = vpop.f32.mrb[4].mxu0 }
 0x342   : > { %v861_v49 = vadd.f32 %v2515_v47, %v860_v48  ;;  %v2639_v50 = vpop.f32.mrb[5].mxu0  ;;  %v1148_v47 = vsub.s32 0, %v3203_v41  ;;  %v1391_v48 = vsub.s32 2, %v3203_v41 }
 0x344   : > { %v865_v51 = vmul.f32 0.70710677, %v861_v49  ;;  %v864_v12 = vmul.f32 0.5, %v861_v49  ;;  %v2855_v49 = vmov 3   ;;  %v1149_v50 = vrot.slane %v3208_v42, %v1148_v47 }
 0x345   : > { %2794 = vset.pattern.permute.xlu1 %v2855_v49 }
 0x346   : > { %vm866_vm8 = vcmp.lt.f32.partialorder %v865_v51, 0.0  ;;  %v867_v52 = vsub.f32 0.0, %v865_v51  ;;  %1137 = vperm.xlu1 %2794, %v2955_v0   ;;  %1156 = vrot.lane.b32.xlu0 %v1149_v50, %s3539_s29  ;;  %v1743_v0 = vsub.s32 5, %v3203_v41 }
 0x348   : > { %v868_v53 = vsel %vm866_vm8, %v867_v52, %v865_v51  ;;  %v1153_v51 = vrot.slane %v3213_v46, %v1148_v47  ;;  %v1392_v52 = vrot.slane %v3208_v42, %v1391_v48 }
 0x349   : > { %v869_v54 = vmul.f32 0.3275911, %v868_v53  ;;  %v882_v56 = vsub.f32 0.0, %v868_v53 }
 0x34a   : > { %1158 = vrot.lane.b32.xlu1 %v1153_v51, %s3539_s29  ;;  %1399 = vrot.lane.b32.xlu0 %v1392_v52, %s2857_s30 }
 0x34b   : > { %v870_v55 = vadd.f32 1.0, %v869_v54  ;;  %v883_v58 = vmul.f32 %v882_v56, %v868_v53  ;;  %v1517_v53 = vsub.s32 3, %v3203_v41  ;;  %v1396_v54 = vrot.slane %v3213_v46, %v1391_v48  ;;  %2796 = vset.pattern.permute.xlu1 %v2849_v3 }
 0x34d   : > { %2809 = vrcp.f32 %v870_v55  ;;  %v884_v61 = vmul.f32 1.442695, %v883_v58  ;;  %v1518_v55 = vrot.slane %v3208_v42, %v1517_v53  ;;  %v1522_v56 = vrot.slane %v3213_v46, %v1517_v53 }
 0x34e   : > { %1401 = vrot.lane.b32.xlu1 %v1396_v54, %s2857_s30  ;;  %v1867_v58 = vsub.s32 6, %v3203_v41 }
 0x34f   : > { %2811 = vpow2.f32 %v884_v61  ;;  %1525 = vrot.lane.b32.xlu0 %v1518_v55, %s2858_s16 }
 0x350   : > { %v1868_v3 = vrot.slane %v3208_v42, %v1867_v58  ;;  %v1872_v61 = vrot.slane %v3213_v46, %v1867_v58 }
 0x352   : > { %1527 = vrot.lane.b32.xlu1 %v1522_v56, %s2858_s16 }
 0x357   : > { %v2810_v57 = vpop.eup %2809 }
 0x358   : > { %v873_v59 = vmul.f32 1.0614054, %v2810_v57 }
 0x359   : > { %v2812_v7 = vpop.eup %2811 }
 0x35a   : > { %v874_v60 = vadd.f32 -1.4531521, %v873_v59  ;;  %v1748_v59 = vrot.slane %v3213_v46, %v1743_v0 }
 0x35c   : > { %v875_v62 = vmul.f32 %v2810_v57, %v874_v60  ;;  %v1991_v60 = vsub.s32 7, %v3203_v41  ;;  %1753 = vrot.lane.b32.xlu1 %v1748_v59, %s2859_s17 }
 0x35e   : > { %v876_v63 = vadd.f32 1.4214138, %v875_v62  ;;  %v1992_v62 = vrot.slane %v3208_v42, %v1991_v60 }
 0x360   : > { %v877_v1 = vmul.f32 %v2810_v57, %v876_v63  ;;  %v1172_v63 = vsub.s32 1, %v3203_v41  ;;  %1877 = vrot.lane.b32.xlu1 %v1872_v61, %s2860_s20 }
 0x362   : > { %v878_v2 = vadd.f32 -0.28449672, %v877_v1  ;;  %v1996_v1 = vrot.slane %v3213_v46, %v1991_v60 }
 0x364   : > { %v879_v4 = vmul.f32 %v2810_v57, %v878_v2  ;;  %v1173_v2 = vrot.slane %v3208_v42, %v1172_v63  ;;  %2001 = vrot.lane.b32.xlu1 %v1996_v1, %s2861_s22 }
 0x366   : > { %v880_v5 = vadd.f32 0.2548296, %v879_v4  ;;  %v1177_v4 = vrot.slane %v3213_v46, %v1172_v63 }
 0x368   : > { %v881_v6 = vmul.f32 %v2810_v57, %v880_v5  ;;  %v1744_v57 = vrot.slane %v3208_v42, %v1743_v0  ;;  %v2550_v5 = vld [vmem:[%s3532_s10 + $0x10] ss:$0 sm:$0xff]  ;;  %1182 = vrot.lane.b32.xlu1 %v1177_v4, %s2862_s23 }
 0x36a   : > { %v886_v8 = vmul.f32 %v2812_v7, %v881_v6  ;;  %1751 = vrot.lane.b32.xlu0 %v1744_v57, %s2859_s17  ;;  %v2551_v6 = vld [vmem:[%s3532_s10 + $0x18] ss:$0 sm:$0xff]  ;;  %v2517_v7 = vld [vmem:[%s3530_s8] ss:$0 sm:$0xff] }
 0x36c   : > { %v887_v9 = vsub.f32 1.0, %v886_v8  ;;  %2125 = vrot.lane.b32.xlu1 %v2551_v6, %s2863_s28 }
 0x36e   : > { %v888_v10 = vsub.f32 0.0, %v887_v9  ;;  %1875 = vrot.lane.b32.xlu0 %v1868_v3, %s2860_s20  ;;  %v1132_v3 = vpop.permute.xlu1 %1131 }
 0x370   : > { %v889_v11 = vsel %vm866_vm8, %v888_v10, %v887_v9 }
 0x371   : > { %v890_v13 = vadd.f32 1.0, %v889_v11 }
 0x372   : > { %1999 = vrot.lane.b32.xlu0 %v1992_v62, %s2861_s22 }
 0x373   : > { %v891_v14 = vmul.f32 %v890_v13, %v864_v12 }
 0x375   : > { %2657 = vmatmul.mubr.msk.f32.vlgmr.msra.gmra.mrb[0].mxu1 %vm790_vm7, %v891_v14 }
 0x376   : > { %1376 = vmatprep.mubr.f32.mxu1 %v2851_v45  ;;  %1180 = vrot.lane.b32.xlu0 %v1173_v2, %s2862_s23 }
 0x37a   : > { %2123 = vrot.lane.b32.xlu0 %v2550_v5, %s2863_s28 }
 0x3c5   : > { %v1138_v5 = vpop.permute.xlu1 %1137 }
 0x3c9   : > { %v1159_v6 = vpop.permute.xlu1 %1158 }
 0x448   : > { %v976_v8 = vpop.f32.mrb[0].mxu1 }
 0x449   : > { %v977_v9 = vadd.f32 %v2517_v7, %v976_v8  ;;  %v2658_v10 = vpop.f32.mrb[1].mxu1  ;;  %v1157_v7 = vpop.permute.xlu0 %1156 }
 0x44b   : > { %v980_v11 = vsub.f32 0.0, %v977_v9 }
 0x44d   : > { %v981_v12 = vmul.f32 1.442695, %v980_v11 }
 0x44f   : > { %2813 = vpow2.f32 %v981_v12 }
 0x459   : > { %v2814_v13 = vpop.eup %2813 }
 0x45a   : > { %v983_v14 = vadd.f32 1.0, %v2814_v13 }
 0x45c   : > { %2815 = vrcp.f32 %v983_v14  ;;  %v1161_v14 = vsel %vm1160_vm13, %v1157_v7, %v1159_v6 }
 0x466   : > { %v2816_v15 = vpop.eup %2815 }
 0x467   : > { %2519 = vmatmul.mubr.msk.f32.vlgmr.msra.gmra.mrb[6].mxu0 %vm790_vm7, %v2816_v15 }
 0x468   : > { %1279 = vmatprep.mubr.f32.mxu0 %v2851_v45 }
 0x53a   : > { %v1071_v16 = vpop.f32.mrb[6].mxu0 }
 0x53b   : > { %v3266_v17 = vmul.f32 %v1071_v16, %v3070_v43  ;;  %v1073_v18 = vpop.f32.mrb[7].mxu0  ;;  %v1402_v16 = vpop.permute.xlu1 %1401 }
 0x53c   : > { %v3269_v19 = vmul.f32 %v1073_v18, %v3072_v44  ;;  %v1400_v18 = vpop.permute.xlu0 %1399 }
 0x53d   : > { %v1078_v20 = vrot.slane %v3266_v17, 4 }
 0x53e   : > { %v1084_v21 = vrot.slane %v3269_v19, 4 }
 0x53f   : > { %v1079_v22 = vadd.f32 %v1078_v20, %v3266_v17 }
 0x540   : > { %v1085_v23 = vadd.f32 %v1084_v21, %v3269_v19 }
 0x541   : > { %v1080_v24 = vrot.slane %v1079_v22, 2 }
 0x542   : > { %v1086_v25 = vrot.slane %v1085_v23, 2 }
 0x543   : > { %v1081_v26 = vadd.f32 %v1080_v24, %v1079_v22 }
 0x544   : > { %v1087_v27 = vadd.f32 %v1086_v25, %v1085_v23  ;;  %v1404_v23 = vsel %vm1403_vm14, %v1400_v18, %v1402_v16  ;;  %v1528_v25 = vpop.permute.xlu1 %1527 }
 0x545   : > { %v1082_v28 = vrot.slane %v1081_v26, 1 }
 0x546   : > { %v1088_v29 = vrot.slane %v1087_v27, 1 }
 0x547   : > { %v1083_v43 = vadd.f32 %v1082_v28, %v1081_v26  ;;  %v1526_v26 = vpop.permute.xlu0 %1525 }
 0x548   : > { %v1089_v30 = vadd.f32 %v1088_v29, %v1087_v27 }
 0x549   : > { %v1090_v31 = vmul.f32 0.125, %v1083_v43  ;;  %v1530_v43 = vsel %vm1529_vm15, %v1526_v26, %v1528_v25 }
 0x54a   : > { %v1091_v32 = vmul.f32 0.125, %v1089_v30  ;;  %v1754_v30 = vpop.permute.xlu1 %1753 }
 0x54b   : > { %v1092_v44 = vsub.f32 %v3266_v17, %v1090_v31  ;;  %v1752_v31 = vpop.permute.xlu0 %1751 }
 0x54c   : > { %v1093_v33 = vsub.f32 %v3269_v19, %v1091_v32 }
 0x54d   : > { %v1094_v34 = vmul.f32 %v1092_v44, %v1092_v44 }
 0x54e   : > { %v1095_v35 = vmul.f32 %v1093_v33, %v1093_v33 }
 0x54f   : > { %v1096_v36 = vrot.slane %v1094_v34, 4 }
 0x550   : > { %v1102_v37 = vrot.slane %v1095_v35, 4 }
 0x551   : > { %v1097_v38 = vadd.f32 %v1096_v36, %v1094_v34  ;;  %v1876_v36 = vpop.permute.xlu0 %1875 }
 0x552   : > { %v1103_v39 = vadd.f32 %v1102_v37, %v1095_v35  ;;  %v1878_v35 = vpop.permute.xlu1 %1877 }
 0x553   : > { %v1098_v40 = vrot.slane %v1097_v38, 2 }
 0x554   : > { %v1104_v47 = vrot.slane %v1103_v39, 2 }
 0x555   : > { %v1099_v48 = vadd.f32 %v1098_v40, %v1097_v38  ;;  %v1879_v40 = vsel %vm1423_vm1, %v1876_v36, %v1878_v35 }
 0x556   : > { %v1105_v49 = vadd.f32 %v1104_v47, %v1103_v39  ;;  %v2002_v47 = vpop.permute.xlu1 %2001 }
 0x557   : > { %v1100_v50 = vrot.slane %v1099_v48, 1 }
 0x558   : > { %v1106_v51 = vrot.slane %v1105_v49, 1 }
 0x559   : > { %v1101_v52 = vadd.f32 %v1100_v50, %v1099_v48  ;;  %v2000_v48 = vpop.permute.xlu0 %1999 }
 0x55a   : > { %v1107_v53 = vadd.f32 %v1106_v51, %v1105_v49 }
 0x55b   : > { %v1108_v54 = vmul.f32 0.125, %v1101_v52  ;;  %v1183_v52 = vpop.permute.xlu1 %1182 }
 0x55c   : > { %v1109_v55 = vmul.f32 0.125, %v1107_v53 }
 0x55d   : > { %v1110_v0 = vadd.f32 1e-06, %v1108_v54  ;;  %v1181_v53 = vpop.permute.xlu0 %1180 }
 0x55e   : > { %v1111_v56 = vadd.f32 1e-06, %v1109_v55  ;;  %v2003_v55 = vsel %vm1204_vm2, %v2000_v48, %v2002_v47 }
 0x55f   : > { %2817 = vrsqrt.f32 %v1110_v0  ;;  %vm1114_vm9 = vcmp.eq.f32.partialorder %v1110_v0, inf  ;;  %v1117_v60 = vand.u32 2147483648, %v1110_v0  ;;  %vm1116_vm10 = vcmp.eq.f32.partialorder %v1110_v0, 0.0 }
 0x560   : > { %2819 = vrsqrt.f32 %v1111_v56  ;;  %vm1121_vm11 = vcmp.eq.f32.partialorder %v1111_v56, inf  ;;  %v1124_v63 = vand.u32 2147483648, %v1111_v56  ;;  %vm1123_vm12 = vcmp.eq.f32.partialorder %v1111_v56, 0.0 }
 0x569   : > { %v2818_v57 = vpop.eup %2817 }
 0x56a   : > { %v2820_v58 = vpop.eup %2819  ;;  %v1113_v59 = vmul.f32 %v2818_v57, %v1110_v0  ;;  %v1185_v57 = vsel %vm1184_vm3, %v1181_v53, %v1183_v52 }
 0x56b   : > { %v1120_v61 = vmul.f32 %v2820_v58, %v1111_v56  ;;  %v2126_v58 = vpop.permute.xlu1 %2125 }
 0x56c   : > { %v1115_v62 = vsel %vm1114_vm9, %v1110_v0, %v1113_v59  ;;  %v2124_v59 = vpop.permute.xlu0 %2123 }
 0x56d   : > { %v1118_v1 = vsel %vm1116_vm10, %v1117_v60, %v1115_v62  ;;  %v1122_v2 = vsel %vm1121_vm11, %v1111_v56, %v1120_v61  ;;  %v2127_v61 = vsel %vm1301_vm4, %v2124_v59, %v2126_v58 }
 0x56e   : > { %v1125_v4 = vsel %vm1123_vm12, %v1124_v63, %v1122_v2  ;;  %2821 = vrcp.f32 %v1118_v1 }
 0x56f   : > { %2823 = vrcp.f32 %v1125_v4  ;;  %v2237_v4 = vld [vmem:[%s3534_s12] sm:$0xff] }
 0x578   : > { %v2822_v8 = vpop.eup %2821 }
 0x579   : > { %v2824_v9 = vpop.eup %2823  ;;  %v1127_v10 = vmul.f32 %v2822_v8, %v1092_v44 }
 0x57a   : > { %v1129_v11 = vmul.f32 %v2824_v9, %v1093_v33  ;;  %v1755_v33 = vsel %vm1549_vm0, %v1752_v31, %v1754_v30 }
 0x57b   : > { %v1134_v12 = vmul.f32 %v1132_v3, %v1127_v10 }
 0x57c   : > { %v1135_v13 = vmul.f32 %v1132_v3, %v1129_v11  ;;  %v1168_v11 = vld [vmem:[%s3533_s11] sm:$0xff] }
 0x57d   : > { %v3278_v15 = vadd.f32 %v1138_v5, %v1134_v12 }
 0x57e   : > { %v3280_v20 = vadd.f32 %v1138_v5, %v1135_v13  ;;  %v2238_v5 = vld [vmem:[%s3534_s12 + $0x8] sm:$0xff] }
 0x57f   : > { %v1166_v21 = vmul.f32 %v1161_v14, %v3278_v15  ;;  %v1409_v27 = vmul.f32 %v1404_v23, %v3278_v15  ;;  %v1535_v32 = vmul.f32 %v1530_v43, %v3278_v15  ;;  %v1761_v38 = vmul.f32 %v1754_v30, %v3278_v15 }
 0x580   : > { %v1167_v22 = vmul.f32 %v1159_v6, %v3280_v20  ;;  %v1165_v24 = vmul.f32 %v1157_v7, %v3280_v20  ;;  %v1410_v28 = vmul.f32 %v1402_v16, %v3280_v20  ;;  %v1408_v29 = vmul.f32 %v1400_v18, %v3280_v20  ;;  %v2366_v6 = vld [vmem:[%s3536_s14] sm:$0xff]  ;;  %v1169_v16 = vld [vmem:[%s3533_s11 + $0x8] sm:$0xff] }
 0x581   : > { %1297 = vrot.lane.b32.xlu0 %v1166_v21, %s2863_s28  ;;  %v1536_v44 = vmul.f32 %v1528_v25, %v3280_v20  ;;  %v1534_v34 = vmul.f32 %v1526_v26, %v3280_v20  ;;  %v1760_v37 = vmul.f32 %v1755_v33, %v3280_v20  ;;  %v1759_v39 = vmul.f32 %v1752_v31, %v3278_v15  ;;  %v2526_v25 = vld [vmem:[%s3533_s11 + $0x20] sm:$0xff] }
 0x582   : > { %1299 = vrot.lane.b32.xlu1 %v1167_v22, %s2863_s28  ;;  %v1884_v49 = vmul.f32 %v1879_v40, %v3280_v20  ;;  %v1885_v50 = vmul.f32 %v1878_v35, %v3278_v15  ;;  %v1883_v51 = vmul.f32 %v1876_v36, %v3278_v15  ;;  %v2007_v54 = vmul.f32 %v2000_v48, %v3278_v15  ;;  %v2535_v48 = vld [vmem:[%s3533_s11 + $0x48] sm:$0xff] }
 0x583   : > { %v2009_v0 = vmul.f32 %v2002_v47, %v3278_v15  ;;  %v2008_v56 = vmul.f32 %v2003_v55, %v3280_v20  ;;  %v1190_v3 = vmul.f32 %v1185_v57, %v3278_v15  ;;  %v2133_v60 = vmul.f32 %v2126_v58, %v3278_v15 }
 0x584   : > { %v2132_v62 = vmul.f32 %v2127_v61, %v3280_v20  ;;  %v1191_v63 = vmul.f32 %v1183_v52, %v3280_v20  ;;  %v1189_v1 = vmul.f32 %v1181_v53, %v3280_v20  ;;  %v2131_v2 = vmul.f32 %v2124_v59, %v3278_v15  ;;  %v2542_v59 = vld [vmem:[%s3533_s11 + $0x60] sm:$0xff] }
 0x585   : > { %1295 = vrot.lane.b32.xlu0 %v1165_v24, %s2863_s28  ;;  %v1643_v22 = vsub.s32 4, %v3203_v41 }
 0x586   : > { %1419 = vrot.lane.b32.xlu1 %v1409_v27, %s2860_s20 }
 0x587   : > { %v1648_v27 = vrot.slane %v3213_v46, %v1643_v22  ;;  %v1644_v46 = vrot.slane %v3208_v42, %v1643_v22  ;;  %v2531_v42 = vld [vmem:[%s3533_s11 + $0x38] sm:$0xff] }
 0x589   : > { %1421 = vrot.lane.b32.xlu0 %v1410_v28, %s2860_s20  ;;  %v1650_v31 = vmul.f32 %v1648_v27, %v3280_v20 }
 0x58a   : > { %1417 = vrot.lane.b32.xlu1 %v1408_v29, %s2860_s20  ;;  %v2527_v29 = vld [vmem:[%s3533_s11 + $0x28] sm:$0xff] }
 0x58d   : > { %1545 = vrot.lane.b32.xlu0 %v1535_v32, %s2859_s17 }
 0x58e   : > { %1547 = vrot.lane.b32.xlu1 %v1536_v44, %s2859_s17  ;;  %v2530_v44 = vld [vmem:[%s3533_s11 + $0x30] sm:$0xff] }
 0x591   : > { %1543 = vrot.lane.b32.xlu0 %v1534_v34, %s2859_s17  ;;  %v1649_v34 = vmul.f32 %v1644_v46, %v3278_v15  ;;  %v2534_v15 = vld [vmem:[%s3533_s11 + $0x40] sm:$0xff] }
 0x592   : > { %1770 = vrot.lane.b32.xlu1 %v1760_v37, %s2858_s16 }
 0x595   : > { %1772 = vrot.lane.b32.xlu0 %v1761_v38, %s2858_s16 }
 0x596   : > { %1768 = vrot.lane.b32.xlu1 %v1759_v39, %s2858_s16 }
 0x599   : > { %1894 = vrot.lane.b32.xlu0 %v1884_v49, %s2857_s30 }
 0x59a   : > { %1896 = vrot.lane.b32.xlu1 %v1885_v50, %s2857_s30 }
 0x59d   : > { %1892 = vrot.lane.b32.xlu0 %v1883_v51, %s2857_s30  ;;  %v2538_v51 = vld [vmem:[%s3533_s11 + $0x50] sm:$0xff] }
 0x59e   : > { %2016 = vrot.lane.b32.xlu1 %v2007_v54, %s2862_s23 }
 0x5a1   : > { %2020 = vrot.lane.b32.xlu0 %v2009_v0, %s2862_s23  ;;  %v2539_v0 = vld [vmem:[%s3533_s11 + $0x58] sm:$0xff] }
 0x5a2   : > { %2018 = vrot.lane.b32.xlu1 %v2008_v56, %s2862_s23  ;;  %s3542_s23 = sshll.u32 %s3544_s19, 4 }
 0x5a3   : > { %s494_s25 = scalar_lea.vmem %s3537_s15, %s3542_s23 }
 0x5a5   : > { %1200 = vrot.lane.b32.xlu0 %v1190_v3, %s2861_s22  ;;  %v2520_v3 = vld [vmem:[%s3533_s11 + $0x10] sm:$0xff] }
 0x5a6   : > { %2144 = vrot.lane.b32.xlu1 %v2133_v60, %s3541_s27 }
 0x5a9   : > { %2142 = vrot.lane.b32.xlu0 %v2132_v62, %s3541_s27 }
 0x5aa   : > { %1202 = vrot.lane.b32.xlu1 %v1191_v63, %s2861_s22  ;;  %v2543_v63 = vld [vmem:[%s3533_s11 + $0x68] sm:$0xff] }
 0x5ad   : > { %1198 = vrot.lane.b32.xlu0 %v1189_v1, %s2861_s22  ;;  %v2521_v1 = vld [vmem:[%s3533_s11 + $0x18] sm:$0xff] }
 0x5ae   : > { %2140 = vrot.lane.b32.xlu1 %v2131_v2, %s3541_s27 }
 0x5b1   : > { %2241 = vperm.xlu0 %2795, %v2237_v4   ;;  %v2546_v4 = vld [vmem:[%s3533_s11 + $0x70] sm:$0xff] }
 0x5b2   : > { %2246 = vperm.xlu1 %2796, %v2238_v5  }
 0x5b6   : > { %2369 = vperm.xlu1 %2796, %v2366_v6   ;;  %v2547_v6 = vld [vmem:[%s3533_s11 + $0x78] sm:$0xff] }
 0x5f3   : > { %v1298_v7 = vpop.permute.xlu0 %1297 }
 0x5f4   : > { %v1300_v8 = vpop.permute.xlu1 %1299 }
 0x5f5   : > { %v1303_v9 = vsel %vm1301_vm4, %v1298_v7, %v1300_v8  ;;  %v2553_v8 = vld [vmem:[%s3533_s11 + $0x88] sm:$0xff] }
 0x5f6   : > { %1312 = vmatprep.subr.mxu1 %v1303_v9 }
 0x5f7   : > { %v1296_v10 = vpop.permute.xlu0 %1295 }
 0x5f8   : > { %v1302_v12 = vsel %vm1301_vm4, %v1296_v10, %v1298_v7  ;;  %v1420_v13 = vpop.permute.xlu1 %1419  ;;  %v2552_v7 = vld [vmem:[%s3533_s11 + $0x80] sm:$0xff] }
 0x5f9   : > { %1313 = vmatpush1.msra.mxu1 %v1302_v12 }
 0x5fa   : > { %2524 = vmatmul.mubr.msk.f32.vlgmr.msra.gmra.mrb[2].mxu1 %vm673_vm5, %v1168_v11 }
 0x5fb   : > { %v1422_v14 = vpop.permute.xlu0 %1421  ;;  %1382 = vmatprep.mubr.f32.mxu1 %v2851_v45 }
 0x5fc   : > { %v1418_v18 = vpop.permute.xlu1 %1417  ;;  %v1425_v21 = vsel %vm1423_vm1, %v1420_v13, %v1422_v14 }
 0x5fd   : > { %v1424_v23 = vsel %vm1423_vm1, %v1418_v18, %v1420_v13  ;;  %1434 = vmatprep.subr.mxu1 %v1425_v21 }
 0x5fe   : > { %2525 = vmatmul.mubr.msk.f32.gmra.mrb[4].mxu1 %vm673_vm5, %v1169_v16 }
 0x5ff   : > { %1435 = vmatpush1.msra.mxu1 %v1424_v23  ;;  %v1546_v24 = vpop.permute.xlu0 %1545  ;;  %1498 = vmatprep.mubr.f32.mxu1 %v2851_v45 }
 0x600   : > { %v1548_v26 = vpop.permute.xlu1 %1547 }
 0x601   : > { %v1551_v28 = vsel %vm1549_vm0, %v1546_v24, %v1548_v26 }
 0x602   : > { %2528 = vmatmul.mubr.msk.f32.vlgmr.msra.gmra.mrb[2].mxu1 %vm673_vm5, %v2526_v25  ;;  %1560 = vmatprep.subr.mxu1 %v1551_v28 }
 0x603   : > { %v1544_v41 = vpop.permute.xlu0 %1543  ;;  %1504 = vmatprep.mubr.f32.mxu1 %v2851_v45 }
 0x604   : > { %v1550_v43 = vsel %vm1549_vm0, %v1544_v41, %v1546_v24  ;;  %v1771_v30 = vpop.permute.xlu1 %1770 }
 0x605   : > { %1561 = vmatpush1.msra.mxu1 %v1550_v43 }
 0x606   : > { %2529 = vmatmul.mubr.msk.f32.gmra.mrb[4].mxu1 %vm673_vm5, %v2527_v29  ;;  %1660 = vmatprep.subr.mxu1 %v1650_v31 }
 0x607   : > { %v1773_v32 = vpop.permute.xlu0 %1772  ;;  %1624 = vmatprep.mubr.f32.mxu1 %v2851_v45 }
 0x608   : > { %v1769_v33 = vpop.permute.xlu1 %1768  ;;  %v1775_v20 = vsel %vm1529_vm15, %v1771_v30, %v1773_v32 }
 0x609   : > { %v1774_v39 = vsel %vm1529_vm15, %v1769_v33, %v1771_v30 }
 0x60a   : > { %2532 = vmatmul.mubr.msk.f32.vlgmr.msra.gmra.mrb[2].mxu1 %vm673_vm5, %v2530_v44 }
 0x60b   : > { %1661 = vmatpush1.msra.mxu1 %v1649_v34  ;;  %v1895_v35 = vpop.permute.xlu0 %1894  ;;  %1630 = vmatprep.mubr.f32.mxu1 %v2851_v45 }
 0x60c   : > { %1784 = vmatprep.subr.mxu1 %v1775_v20  ;;  %v1897_v36 = vpop.permute.xlu1 %1896 }
 0x60d   : > { %v1899_v40 = vsel %vm1403_vm14, %v1895_v35, %v1897_v36 }
 0x60e   : > { %2533 = vmatmul.mubr.msk.f32.gmra.mrb[4].mxu1 %vm673_vm5, %v2531_v42 }
 0x60f   : > { %v1893_v37 = vpop.permute.xlu0 %1892  ;;  %1724 = vmatprep.mubr.f32.mxu1 %v2851_v45 }
 0x610   : > { %v2017_v38 = vpop.permute.xlu1 %2016  ;;  %v1898_v53 = vsel %vm1403_vm14, %v1893_v37, %v1895_v35 }
 0x612   : > { %2536 = vmatmul.mubr.msk.f32.vlgmr.msra.gmra.mrb[2].mxu1 %vm673_vm5, %v2534_v15 }
 0x613   : > { %1785 = vmatpush1.msra.mxu1 %v1774_v39  ;;  %v2021_v47 = vpop.permute.xlu0 %2020  ;;  %1730 = vmatprep.mubr.f32.mxu1 %v2851_v45 }
 0x614   : > { %1908 = vmatprep.subr.mxu1 %v1899_v40  ;;  %v2019_v49 = vpop.permute.xlu1 %2018 }
 0x615   : > { %v2023_v54 = vsel %vm1184_vm3, %v2019_v49, %v2021_v47  ;;  %v2022_v61 = vsel %vm1184_vm3, %v2017_v38, %v2019_v49 }
 0x616   : > { %2537 = vmatmul.mubr.msk.f32.gmra.mrb[4].mxu1 %vm673_vm5, %v2535_v48 }
 0x617   : > { %v1201_v50 = vpop.permute.xlu0 %1200  ;;  %1848 = vmatprep.mubr.f32.mxu1 %v2851_v45 }
 0x618   : > { %v2145_v52 = vpop.permute.xlu1 %2144 }
 0x61a   : > { %2540 = vmatmul.mubr.msk.f32.vlgmr.msra.gmra.mrb[2].mxu1 %vm673_vm5, %v2538_v51 }
 0x61b   : > { %1909 = vmatpush1.msra.mxu1 %v1898_v53  ;;  %v2143_v55 = vpop.permute.xlu0 %2142  ;;  %1854 = vmatprep.mubr.f32.mxu1 %v2851_v45 }
 0x61c   : > { %2032 = vmatprep.subr.mxu1 %v2023_v54  ;;  %v1203_v56 = vpop.permute.xlu1 %1202  ;;  %v2147_v62 = vsel %vm1160_vm13, %v2143_v55, %v2145_v52 }
 0x61d   : > { %v1206_v57 = vsel %vm1204_vm2, %v1201_v50, %v1203_v56 }
 0x61e   : > { %1215 = vmatprep.subr.mxu0 %v1206_v57  ;;  %2541 = vmatmul.mubr.msk.f32.gmra.mrb[4].mxu1 %vm673_vm5, %v2539_v0 }
 0x61f   : > { %v1199_v58 = vpop.permute.xlu0 %1198  ;;  %1972 = vmatprep.mubr.f32.mxu1 %v2851_v45 }
 0x620   : > { %v1205_v60 = vsel %vm1204_vm2, %v1199_v58, %v1201_v50  ;;  %v2141_v2 = vpop.permute.xlu1 %2140 }
 0x621   : > { %1216 = vmatpush1.msra.mxu0 %v1205_v60  ;;  %v2146_v5 = vsel %vm1160_vm13, %v2141_v2, %v2143_v55 }
 0x622   : > { %2544 = vmatmul.mubr.msk.f32.vlgmr.msra.gmra.mrb[2].mxu1 %vm673_vm5, %v2542_v59  ;;  %2522 = vmatmul.mubr.msk.f32.vlgmr.msra.gmra.mrb[8].mxu0 %vm673_vm5, %v2520_v3 }
 0x623   : > { %2033 = vmatpush1.msra.mxu1 %v2022_v61  ;;  %1978 = vmatprep.mubr.f32.mxu1 %v2851_v45 }
 0x624   : > { %2156 = vmatprep.subr.mxu1 %v2147_v62  ;;  %1285 = vmatprep.mubr.f32.mxu0 %v2851_v45 }
 0x626   : > { %2545 = vmatmul.mubr.msk.f32.gmra.mrb[4].mxu1 %vm673_vm5, %v2543_v63  ;;  %2523 = vmatmul.mubr.msk.f32.gmra.mrb[10].mxu0 %vm673_vm5, %v2521_v1 }
 0x627   : > { %2096 = vmatprep.mubr.f32.mxu1 %v2851_v45  ;;  %2439 = vmatprep.mubr.f32.mxu0 %v2851_v45 }
 0x62a   : > { %2548 = vmatmul.mubr.msk.f32.vlgmr.msra.gmra.mrb[2].mxu1 %vm673_vm5, %v2546_v4 }
 0x62b   : > { %2157 = vmatpush1.msra.mxu1 %v2146_v5  ;;  %2102 = vmatprep.mubr.f32.mxu1 %v2851_v45 }
 0x62e   : > { %2549 = vmatmul.mubr.msk.f32.gmra.mrb[4].mxu1 %vm673_vm5, %v2547_v6 }
 0x62f   : > { %2220 = vmatprep.mubr.f32.mxu1 %v2851_v45 }
 0x630   : > { %v2242_v14 = vpop.permute.xlu0 %2241 }
 0x631   : > { %v2247_v28 = vpop.permute.xlu1 %2246 }
 0x632   : > { %2554 = vmatmul.mubr.msk.f32.vlgmr.msra.gmra.mrb[2].mxu1 %vm673_vm5, %v2552_v7 }
 0x633   : > { %2226 = vmatprep.mubr.f32.mxu1 %v2851_v45 }
 0x636   : > { %2555 = vmatmul.mubr.msk.f32.gmra.mrb[4].mxu1 %vm673_vm5, %v2553_v8 }
 0x6f5   : > { %v1281_v9 = vpop.f32.mrb[8].mxu0 }
 0x6f6   : > { %v1283_v10 = vpop.f32.mrb[9].mxu0 }
 0x6f9   : > { %v1287_v11 = vpop.f32.mrb[10].mxu0 }
 0x6fa   : > { %v1289_v12 = vpop.f32.mrb[11].mxu0 }
 0x705   : > { %v2222_v13 = vpop.f32.mrb[2].mxu1 }
 0x706   : > { %v2735_v16 = vadd.f32 %v2222_v13, %v1281_v9  ;;  %v2224_v18 = vpop.f32.mrb[3].mxu1 }
 0x707   : > { %v2736_v21 = vadd.f32 %v2224_v18, %v1283_v10 }
 0x708   : > { %v3456_v22 = vadd.f32 %v2735_v16, %v2242_v14 }
 0x709   : > { %v3458_v23 = vadd.f32 %v2736_v21, %v2242_v14  ;;  %v2228_v45 = vpop.f32.mrb[4].mxu1 }
 0x70a   : > { %v3461_v24 = vmul.f32 0.70710677, %v3456_v22  ;;  %v2737_v25 = vadd.f32 %v2228_v45, %v1287_v11  ;;  %v2230_v26 = vpop.f32.mrb[5].mxu1 }
 0x70b   : > { %v3464_v27 = vmul.f32 0.70710677, %v3458_v23  ;;  %v2738_v41 = vadd.f32 %v2230_v26, %v1289_v12 }
 0x70c   : > { %vm2261_vm5 = vcmp.lt.f32.partialorder %v3461_v24, 0.0  ;;  %v2265_v29 = vsub.f32 0.0, %v3461_v24  ;;  %v3468_v43 = vadd.f32 %v2737_v25, %v2247_v28 }
 0x70d   : > { %vm2262_vm6 = vcmp.lt.f32.partialorder %v3464_v27, 0.0  ;;  %v2266_v30 = vsub.f32 0.0, %v3464_v27  ;;  %v3472_v31 = vadd.f32 %v2738_v41, %v2247_v28 }
 0x70e   : > { %v2269_v46 = vsel %vm2261_vm5, %v2265_v29, %v3461_v24  ;;  %v3478_v32 = vmul.f32 0.70710677, %v3468_v43 }
 0x70f   : > { %v2270_v44 = vsel %vm2262_vm6, %v2266_v30, %v3464_v27  ;;  %v2273_v33 = vmul.f32 0.3275911, %v2269_v46  ;;  %v3486_v42 = vmul.f32 0.70710677, %v3472_v31  ;;  %v2325_v48 = vsub.f32 0.0, %v2269_v46 }
 0x710   : > { %v2274_v34 = vmul.f32 0.3275911, %v2270_v44  ;;  %vm2263_vm7 = vcmp.lt.f32.partialorder %v3478_v32, 0.0  ;;  %v2267_v20 = vsub.f32 0.0, %v3478_v32  ;;  %v2326_v50 = vsub.f32 0.0, %v2270_v44 }
 0x711   : > { %v2277_v35 = vadd.f32 1.0, %v2273_v33  ;;  %vm2264_vm8 = vcmp.lt.f32.partialorder %v3486_v42, 0.0  ;;  %v2268_v38 = vsub.f32 0.0, %v3486_v42  ;;  %v2329_v52 = vmul.f32 %v2325_v48, %v2269_v46 }
 0x712   : > { %v2278_v36 = vadd.f32 1.0, %v2274_v34  ;;  %v2271_v37 = vsel %vm2263_vm7, %v2267_v20, %v3478_v32  ;;  %v2330_v0 = vmul.f32 %v2326_v50, %v2270_v44  ;;  %v2254_v27 = vmul.f32 0.5, %v3458_v23 }
 0x713   : > { %2825 = vrcp.f32 %v2277_v35  ;;  %v2275_v15 = vmul.f32 0.3275911, %v2271_v37  ;;  %v2272_v40 = vsel %vm2264_vm8, %v2268_v38, %v3486_v42  ;;  %v2327_v53 = vsub.f32 0.0, %v2271_v37  ;;  %v2370_v42 = vpop.permute.xlu1 %2369 }
 0x714   : > { %2827 = vrcp.f32 %v2278_v36  ;;  %v2276_v47 = vmul.f32 0.3275911, %v2272_v40  ;;  %v2333_v3 = vmul.f32 1.442695, %v2329_v52  ;;  %v2328_v61 = vsub.f32 0.0, %v2272_v40 }
 0x715   : > { %v2279_v39 = vadd.f32 1.0, %v2275_v15  ;;  %v2331_v60 = vmul.f32 %v2327_v53, %v2271_v37  ;;  %v2335_v63 = vmul.f32 1.442695, %v2330_v0 }
 0x716   : > { %v2280_v49 = vadd.f32 1.0, %v2276_v47  ;;  %v2332_v9 = vmul.f32 %v2328_v61, %v2272_v40 }
 0x717   : > { %2829 = vrcp.f32 %v2279_v39  ;;  %v2337_v8 = vmul.f32 1.442695, %v2331_v60 }
 0x718   : > { %2831 = vrcp.f32 %v2280_v49  ;;  %v2339_v45 = vmul.f32 1.442695, %v2332_v9  ;;  %v2256_v9 = vmul.f32 0.5, %v3472_v31 }
 0x719   : > { %2833 = vpow2.f32 %v2333_v3 }
 0x71a   : > { %2835 = vpow2.f32 %v2335_v63 }
 0x71b   : > { %2837 = vpow2.f32 %v2337_v8 }
 0x71c   : > { %2839 = vpow2.f32 %v2339_v45 }
 0x71d   : > { %v2826_v51 = vpop.eup %2825 }
 0x71e   : > { %v2828_v54 = vpop.eup %2827  ;;  %v2289_v55 = vmul.f32 1.0614054, %v2826_v51 }
 0x71f   : > { %v2290_v56 = vmul.f32 1.0614054, %v2828_v54 }
 0x720   : > { %v2293_v57 = vadd.f32 -1.4531521, %v2289_v55 }
 0x721   : > { %v2830_v58 = vpop.eup %2829  ;;  %v2294_v59 = vadd.f32 -1.4531521, %v2290_v56 }
 0x722   : > { %v2297_v62 = vmul.f32 %v2826_v51, %v2293_v57  ;;  %v2291_v1 = vmul.f32 1.0614054, %v2830_v58  ;;  %v2832_v6 = vpop.eup %2831 }
 0x723   : > { %v2298_v2 = vmul.f32 %v2828_v54, %v2294_v59  ;;  %v2292_v12 = vmul.f32 1.0614054, %v2832_v6  ;;  %v2834_v35 = vpop.eup %2833 }
 0x724   : > { %v2301_v4 = vadd.f32 1.4214138, %v2297_v62  ;;  %v2295_v5 = vadd.f32 -1.4531521, %v2291_v1  ;;  %v2836_v37 = vpop.eup %2835  ;;  %v2253_v1 = vmul.f32 0.5, %v3456_v22 }
 0x725   : > { %v2302_v7 = vadd.f32 1.4214138, %v2298_v2  ;;  %v2296_v18 = vadd.f32 -1.4531521, %v2292_v12  ;;  %v2838_v50 = vpop.eup %2837  ;;  %v2255_v2 = vmul.f32 0.5, %v3468_v43  ;;  %v2365_v43 = vld [vmem:[%s3535_s13] sm:$0xff] }
 0x726   : > { %v2305_v10 = vmul.f32 %v2826_v51, %v2301_v4  ;;  %v2299_v11 = vmul.f32 %v2830_v58, %v2295_v5 }
 0x727   : > { %v2306_v13 = vmul.f32 %v2828_v54, %v2302_v7  ;;  %v2300_v28 = vmul.f32 %v2832_v6, %v2296_v18 }
 0x728   : > { %v2309_v14 = vadd.f32 -0.28449672, %v2305_v10  ;;  %v2303_v16 = vadd.f32 1.4214138, %v2299_v11 }
 0x729   : > { %v2310_v21 = vadd.f32 -0.28449672, %v2306_v13  ;;  %v2304_v46 = vadd.f32 1.4214138, %v2300_v28 }
 0x72a   : > { %v2313_v25 = vmul.f32 %v2826_v51, %v2309_v14  ;;  %v2307_v26 = vmul.f32 %v2830_v58, %v2303_v16 }
 0x72b   : > { %v2314_v41 = vmul.f32 %v2828_v54, %v2310_v21  ;;  %v2308_v20 = vmul.f32 %v2832_v6, %v2304_v46 }
 0x72c   : > { %v2317_v29 = vadd.f32 0.2548296, %v2313_v25  ;;  %v2311_v30 = vadd.f32 -0.28449672, %v2307_v26 }
 0x72d   : > { %v2318_v44 = vadd.f32 0.2548296, %v2314_v41  ;;  %v2312_v39 = vadd.f32 -0.28449672, %v2308_v20 }
 0x72e   : > { %v2321_v33 = vmul.f32 %v2826_v51, %v2317_v29  ;;  %v2315_v34 = vmul.f32 %v2830_v58, %v2311_v30 }
 0x72f   : > { %v2322_v36 = vmul.f32 %v2828_v54, %v2318_v44  ;;  %v2316_v49 = vmul.f32 %v2832_v6, %v2312_v39  ;;  %v2840_v54 = vpop.eup %2839 }
 0x730   : > { %v2341_v15 = vmul.f32 %v2834_v35, %v2321_v33  ;;  %v2319_v38 = vadd.f32 0.2548296, %v2315_v34 }
 0x731   : > { %v2342_v40 = vmul.f32 %v2836_v37, %v2322_v36  ;;  %v2320_v0 = vadd.f32 0.2548296, %v2316_v49 }
 0x732   : > { %v2345_v47 = vsub.f32 1.0, %v2341_v15  ;;  %v2323_v48 = vmul.f32 %v2830_v58, %v2319_v38 }
 0x733   : > { %v2346_v52 = vsub.f32 1.0, %v2342_v40  ;;  %v2324_v59 = vmul.f32 %v2832_v6, %v2320_v0 }
 0x734   : > { %v2349_v53 = vsub.f32 0.0, %v2345_v47  ;;  %v2343_v55 = vmul.f32 %v2838_v50, %v2323_v48 }
 0x735   : > { %v2350_v56 = vsub.f32 0.0, %v2346_v52  ;;  %v2344_v60 = vmul.f32 %v2840_v54, %v2324_v59 }
 0x736   : > { %v2353_v51 = vsel %vm2261_vm5, %v2349_v53, %v2345_v47  ;;  %v2347_v57 = vsub.f32 1.0, %v2343_v55 }
 0x737   : > { %v2357_v61 = vadd.f32 1.0, %v2353_v51  ;;  %v2354_v62 = vsel %vm2262_vm6, %v2350_v56, %v2346_v52  ;;  %v2348_v63 = vsub.f32 1.0, %v2344_v60 }
 0x738   : > { %v2351_v3 = vsub.f32 0.0, %v2347_v57  ;;  %v2358_v5 = vadd.f32 1.0, %v2354_v62 }
 0x739   : > { %v2352_v24 = vsub.f32 0.0, %v2348_v63  ;;  %v2361_v7 = vmul.f32 %v2357_v61, %v2253_v1 }
 0x73a   : > { %v2355_v58 = vsel %vm2263_vm7, %v2351_v3, %v2347_v57  ;;  %v2362_v11 = vmul.f32 %v2358_v5, %v2254_v27 }
 0x73b   : > { %v2359_v4 = vadd.f32 1.0, %v2355_v58  ;;  %v2356_v8 = vsel %vm2264_vm8, %v2352_v24, %v2348_v63 }
 0x73c   : > { %v2360_v32 = vadd.f32 1.0, %v2356_v8 }
 0x73d   : > { %v2363_v6 = vmul.f32 %v2359_v4, %v2255_v2 }
 0x73e   : > { %v2364_v12 = vmul.f32 %v2360_v32, %v2256_v9 }
 0x73f   : > { %v2733_v10 = vpack.c.bf16 %v2363_v6, %v2361_v7 }
 0x740   : > { %v2731_v22 = vpack.c.bf16 %v2364_v12, %v2362_v11 }
 0x742   : > { %2732 = vmatprep.subr.bf16.mxu0 %v2731_v22 }
 0x743   : > { %2734 = vmatpush1.bf16.msra.mxu0 %v2733_v10 }
 0x746   : > { %2556 = vmatmul.mubr.msk.f32.vlgmr.msra.gmra.mrb[12].mxu0 %vm1204_vm2, %v2365_v43 }
 0x819   : > { %v2441_v13 = vpop.f32.mrb[12].mxu0 }
 0x81a   : > { %v2442_v14 = vadd.f32 %v2441_v13, %v2370_v42  ;;  %v2443_v16 = vpop.f32.mrb[13].mxu0 }
 0x81b   : > { %v2444_v23 = vadd.f32 %v2443_v16, %v2370_v42 }
 0x81c   : > { %v2446_v31 = vadd.f32 %v2442_v14, %v3266_v17 }
 0x81d   : > { %v2447_v18 = vadd.f32 %v2444_v23, %v3269_v19 }
 0x81e   : > { %2448 = vst [vmem:[%s494_s25] sm:$0xff] %v2446_v31 }
 0x81f   : > { %2449 = vst [vmem:[%s494_s25 + $0x8] sm:$0xff] %v2447_v18 }
 0x820 PF: > { %s25_s18 = sadd.s32 1, %s2847_s18  }
 0x821   : > { %p22_p4 = scmp.ge.s32.totalorder %s25_s18, 4  }
 0x823   :  { %24 = sbr.rel (!%p22_p4) target bundleno = 1 (0x1), region = 118 }

</bundles_post_ra>
